<compile_context>
chip_gen: v7x
topology: tpu7x:2x2x1
jax: 0.10.0
libtpu: 0.0.40
codegen_flags: <defaults>
</compile_context>

<pallas_src>
import functools
import numpy as np

import jax
import jax.numpy as jnp
from jax.experimental import pallas as pl
from jax.experimental.pallas import tpu as pltpu

LN_EPS = 1e-5                       # nn.LayerNorm default


# --------------------------- hardware-aware sizing --------------------------
def _vmem_capacity_bytes():
    try:
        return int(pltpu.get_tpu_info().vmem_capacity_bytes)
    except Exception:
        return 64 * 1024 * 1024      # conservative default (v7x per-core VMEM)


def _vmem_limit_bytes():
    # ~96 MiB on v5e/v6e (128 MiB physical), ~48 MiB on v7x (64 MiB physical).
    return int(_vmem_capacity_bytes() * 3 // 4)


def _vmem_budget_bytes():
    # Budget used when choosing row tiles: leave headroom for double-buffering
    # slack, compiler-internal scratch and vreg spill.
    return int(_vmem_capacity_bytes() * 11 // 20)


_SINGLE_BUFFER_OK = None


def _single_buffer_supported():
    """Probe once whether pipeline_mode=pl.Buffered(1) lowers on this install."""
    global _SINGLE_BUFFER_OK
    if _SINGLE_BUFFER_OK is None:
        try:
            def k(a_ref, b_ref, o_ref):
                o_ref[...] = a_ref[...] + b_ref[...]
            x = jnp.zeros((8, 128), jnp.float32)
            spec_sb = pl.BlockSpec((8, 128), lambda i: (0, 0),
                                   pipeline_mode=pl.Buffered(1))
            out = pl.pallas_call(
                k, out_shape=jax.ShapeDtypeStruct((8, 128), jnp.float32),
                grid=(1,),
                in_specs=[pl.BlockSpec((8, 128), lambda i: (0, 0)), spec_sb],
                out_specs=pl.BlockSpec((8, 128), lambda i: (0, 0)),
            )(x, x)
            jax.block_until_ready(out)
            _SINGLE_BUFFER_OK = True
        except Exception:
            _SINGLE_BUFFER_OK = False
    return _SINGLE_BUFFER_OK


def _const_spec(shape):
    """BlockSpec for a grid-invariant operand of a 1-D grid; single-buffered
    when supported so it does not burn double-buffered VMEM."""
    nd = len(shape)
    imap = lambda i: (0,) * nd
    if _single_buffer_supported():
        return pl.BlockSpec(shape, imap, pipeline_mode=pl.Buffered(1))
    return pl.BlockSpec(shape, imap)


def _align_rank(rows):
    if rows % 256 == 0:
        return 3
    if rows % 128 == 0:
        return 2
    if rows % 8 == 0:
        return 1
    return 0


def _pick_tile(total, unit, max_rows, extra_ok=None):
    """Pick how many `unit`-row groups go into one step of a 1-D grid.

    Hard constraint: rows % 8 == 0 or rows == total*unit (Mosaic sublane rule).
    Preferences: fits the VMEM-derived max_rows, grid has >= 2 steps (v7x: both
    TensorCores busy), 256/128-aligned rows, then larger rows.
    """
    full_rows = total * unit
    cands = []
    for g in range(1, total + 1):
        if total % g:
            continue
        rows = g * unit
        if rows % 8 != 0 and rows != full_rows:
            continue
        if extra_ok is not None and not extra_ok(g):
            continue
        cands.append(g)
    if not cands:
        return total
    fitting = [g for g in cands if g * unit <= max_rows]
    pool = fitting if fitting else [min(cands)]

    def score(g):
        rows = g * unit
        return (total // g >= 2, _align_rank(rows), rows)

    return max(pool, key=score)


def _attn_max_rows(C, N, num_heads, mb_rows, weight_buf):
    budget = _vmem_budget_bytes()
    # per-row bytes: bf16 in/out double-buffered, bf16 qkv, f32 x/xn/acc,
    # per-head f32 score & prob rows (N wide).
    per_row = 4 * C + 4 * C + 6 * C + 12 * C + 8 * N
    fixed = ((C * 3 * C + C * C) * 2 * weight_buf          # Wqkv + Wproj (bf16)
             + num_heads * mb_rows * N * N * 2 * 2         # fused bias(+mask)
             + 16 * C * 4)                                 # biases + LN params
    rows = (budget - fixed) // max(per_row, 1)
    return int(max(N, min(1024, rows)))


def _mlp_max_rows(C, hidden, hc, weight_buf):
    budget = _vmem_budget_bytes()
    per_row = 4 * C + 4 * C + 2 * C + 8 * C + 6 * hc
    fixed = (C * hidden + hidden * C) * 2 * weight_buf + hidden * 4 + 8 * C * 4
    rows = (budget - fixed) // max(per_row, 1)
    return int(max(8, min(1024, rows)))


def _pick_hidden_chunk(hidden, max_chunk=512):
    if hidden <= max_chunk:
        return hidden
    cands = [hc for hc in range(8, max_chunk + 1) if hidden % hc == 0]
    if not cands:
        return hidden
    return max(cands, key=lambda hc: (hc % 128 == 0, hc))


# ----------------------------- kernel helpers ------------------------------
def _layernorm(x, gamma, beta):
    mu = jnp.mean(x, axis=-1, keepdims=True)
    var = jnp.mean(jnp.square(x - mu), axis=-1, keepdims=True)
    return (x - mu) * jax.lax.rsqrt(var + LN_EPS) * gamma + beta


def _gelu_exact(x):
    # matches torch.nn.GELU() default (erf formulation)
    return 0.5 * x * (1.0 + jax.lax.erf(x * jnp.float32(1.0 / np.sqrt(2.0))))


# ------------------------------ Pallas kernels -----------------------------
def attn_kernel(x_ref, wqkv_ref, bqkv_ref, wproj_ref, bproj_ref,
                g1_ref, be1_ref, bm_ref, o_ref,
                *, num_heads, head_dim, dim, wb, n, mb):
    """One grid step = WB windows (WB*N rows):
       LN1 -> QKV -> per-head MHSA(+bias/mask) -> accumulated proj -> +residual.

    x_ref/o_ref: (WB*N, C) bf16.  bm_ref: (H, MB, N, N) bf16 fused bias(+mask).
    The 1/sqrt(head_dim) q-scale is pre-folded into wqkv/bqkv.
    """
    x = x_ref[...].astype(jnp.float32)                             # (WB*N, C)
    xn = _layernorm(x, g1_ref[0], be1_ref[0])
    # single full-width QKV matmul (bf16 operands, f32 accumulation); the
    # intermediate is kept in bf16: halves the largest live value and lets the
    # per-head q/k/v slices feed the MXU without extra casts.
    qkv = (jnp.dot(xn.astype(jnp.bfloat16), wqkv_ref[...],
                   preferred_element_type=jnp.float32)
           + bqkv_ref[0]).astype(jnp.bfloat16)                     # (WB*N, 3C)

    acc = x                                 # attention-branch residual folded in
    for h in range(num_heads):              # static unroll; matmuls batched over WB
        o0 = h * head_dim
        q = qkv[:, o0:o0 + head_dim].reshape(wb, n, head_dim)
        k = qkv[:, dim + o0:dim + o0 + head_dim].reshape(wb, n, head_dim)
        v = qkv[:, 2 * dim + o0:2 * dim + o0 + head_dim].reshape(wb, n, head_dim)
        s = jnp.einsum('wqd,wkd->wqk', q, k,
                       preferred_element_type=jnp.float32)         # (WB, N, N) f32
        bmh = bm_ref[h]                                            # (MB, N, N) bf16
        if mb == wb or mb == 1:
            s = s + bmh                                            # direct / broadcast
        else:                   # wb % mb == 0 (shifted block, WB spans >1 image)
            s = (s.reshape(wb // mb, mb, n, n) + bmh[None]).reshape(wb, n, n)
        s = s - jnp.max(s, axis=-1, keepdims=True)
        p = jnp.exp(s)
        p = p * pl.reciprocal(jnp.sum(p, axis=-1, keepdims=True), approx=True)
        ctx = jnp.einsum('wqk,wkd->wqd', p.astype(jnp.bfloat16), v,
                         preferred_element_type=jnp.float32)       # (WB, N, hd)
        # accumulate the output projection per head: kills the lane-axis concat
        acc = acc + jnp.dot(ctx.reshape(wb * n, head_dim).astype(jnp.bfloat16),
                            wproj_ref[o0:o0 + head_dim, :],
                            preferred_element_type=jnp.float32)
    o_ref[...] = (acc + bproj_ref[0]).astype(o_ref.dtype)


def mlp_kernel(x_ref, g2_ref, be2_ref, w1_ref, b1_ref, w2_ref, b2_ref, o_ref,
               *, hidden, hc):
    """Token tile: y = x + fc2(GELU(fc1(LN2(x)))).  The hidden dimension is
    processed in chunks of `hc`, accumulating fc2 partials into an f32
    accumulator, so the (TM, hidden) activation never lives whole."""
    x = x_ref[...].astype(jnp.float32)                             # (TM, C)
    xn = _layernorm(x, g2_ref[0], be2_ref[0]).astype(jnp.bfloat16)
    b1 = b1_ref[0]                                                 # (hidden,) f32
    acc = x                                                        # residual folded in
    for c in range(hidden // hc):
        lo = c * hc
        hk = jnp.dot(xn, w1_ref[:, lo:lo + hc],
                     preferred_element_type=jnp.float32) + b1[lo:lo + hc]
        hk = _gelu_exact(hk).astype(jnp.bfloat16)
        acc = acc + jnp.dot(hk, w2_ref[lo:lo + hc, :],
                            preferred_element_type=jnp.float32)
    o_ref[...] = (acc + b2_ref[0]).astype(o_ref.dtype)


# ------------------------------- wrappers ----------------------------------
def attention_pallas(xw, p, attn_mask, num_heads, nW, shift):
    """xw: (B_, N, C) bf16 windows (already rolled + partitioned).
    Returns xw + proj(MHSA(LN1(xw))) as bf16 (residual fused in kernel)."""
    B_, N, C = xw.shape
    head_dim = C // num_heads
    wbuf = 1 if _single_buffer_supported() else 2

    # Fuse relative-position bias with the shift mask host-side (head-major,
    # bf16).  No host-side tiling: the kernel broadcasts over image repeats.
    if shift == 0 or attn_mask is None:
        bm = p["rel_bias"][:, None]                        # (H, 1, N, N)
    else:
        bm = p["rel_bias"][:, None] + attn_mask[None]      # (H, nW, N, N)
    bm = bm.astype(jnp.bfloat16)
    MB = bm.shape[1]

    max_rows = _attn_max_rows(C, N, num_heads, MB, wbuf)
    mask_ok = (lambda g: True) if MB == 1 else \
              (lambda g: (MB % g == 0) or (g % MB == 0))
    wb = _pick_tile(B_, N, max_rows, extra_ok=mask_ok)
    rb = wb * N
    mb = min(wb, MB)
    n_mask_blocks = MB // mb
    if n_mask_blocks > 1:
        bm_spec = pl.BlockSpec((num_heads, mb, N, N),
                               lambda i: (0, i % n_mask_blocks, 0, 0))
    else:
        bm_spec = _const_spec((num_heads, mb, N, N))       # grid-invariant

    kernel = functools.partial(attn_kernel, num_heads=num_heads,
                               head_dim=head_dim, dim=C, wb=wb, n=N, mb=mb)
    xf = xw.reshape(B_ * N, C)
    out = pl.pallas_call(
        kernel,
        out_shape=jax.ShapeDtypeStruct((B_ * N, C), jnp.bfloat16),
        grid=(B_ // wb,),
        in_specs=[
            pl.BlockSpec((rb, C), lambda i: (i, 0)),       # x rows (WB windows)
            _const_spec((C, 3 * C)),                       # Wqkv (bf16, scale folded)
            _const_spec((1, 3 * C)),                       # bqkv (scale folded)
            _const_spec((C, C)),                           # Wproj (bf16)
            _const_spec((1, C)),                           # bproj
            _const_spec((1, C)),                           # gamma1
            _const_spec((1, C)),                           # beta1
            bm_spec,                                       # fused bias(+mask) bf16
        ],
        out_specs=pl.BlockSpec((rb, C), lambda i: (i, 0)),
        compiler_params=pltpu.CompilerParams(
            dimension_semantics=("parallel",),
            vmem_limit_bytes=_vmem_limit_bytes()),
    )(xf, p["wqkv"], p["bqkv"], p["wproj"], p["bproj"], p["g1"], p["be1"], bm)
    return out.reshape(B_, N, C)


def mlp_pallas(x, p):
    """x: (B, L, C) bf16.  Returns x + MLP(LN2(x)) as bf16, fused in one kernel."""
    B, L, C = x.shape
    hidden = p["w1"].shape[1]
    hc = _pick_hidden_chunk(hidden)
    wbuf = 1 if _single_buffer_supported() else 2
    M = B * L
    tm = _pick_tile(M, 1, _mlp_max_rows(C, hidden, hc, wbuf))
    xf = x.reshape(M, C)
    kernel = functools.partial(mlp_kernel, hidden=hidden, hc=hc)
    out = pl.pallas_call(
        kernel,
        out_shape=jax.ShapeDtypeStruct((M, C), jnp.bfloat16),
        grid=(M // tm,),
        in_specs=[
            pl.BlockSpec((tm, C), lambda i: (i, 0)),
            _const_spec((1, C)),                           # gamma2
            _const_spec((1, C)),                           # beta2
            _const_spec((C, hidden)),                      # W1 (bf16)
            _const_spec((1, hidden)),                      # b1
            _const_spec((hidden, C)),                      # W2 (bf16)
            _const_spec((1, C)),                           # b2
        ],
        out_specs=pl.BlockSpec((tm, C), lambda i: (i, 0)),
        compiler_params=pltpu.CompilerParams(
            dimension_semantics=("parallel",),
            vmem_limit_bytes=_vmem_limit_bytes()),
    )(xf, p["g2"], p["be2"], p["w1"], p["b1"], p["w2"], p["b2"])
    return out.reshape(B, L, C)


# ------------------------ window partition / reverse ------------------------
def window_partition(x, ws):
    B, H, W, C = x.shape
    x = x.reshape(B, H // ws, ws, W // ws, ws, C)
    return x.transpose(0, 1, 3, 2, 4, 5).reshape(-1, ws, ws, C)


def window_reverse(windows, ws, H, W):
    B = windows.shape[0] // ((H * W) // (ws * ws))
    x = windows.reshape(B, H // ws, W // ws, ws, ws, -1)
    return x.transpose(0, 1, 3, 2, 4, 5).reshape(B, H, W, -1)


# ---------------------------- block / layer glue ----------------------------
def swin_block_forward(x, p, H, W, window_size, shift_size, num_heads, attn_mask):
    B, L, C = x.shape
    assert L == H * W
    # TODO(synk): fold the roll + window partition/reverse into the attention
    # BlockSpec (grid over (B, H//ws, W//ws)); done in bf16 here to halve its
    # HBM traffic in the meantime.
    xi = x.reshape(B, H, W, C)
    if shift_size > 0:
        xi = jnp.roll(xi, shift=(-shift_size, -shift_size), axis=(1, 2))
    xw = window_partition(xi, window_size).reshape(-1, window_size * window_size, C)
    nW = (H // window_size) * (W // window_size)
    # LN1 + attention + proj + residual fully fused inside the kernel.
    yw = attention_pallas(xw, p, attn_mask, num_heads, nW, shift_size)
    yw = yw.reshape(-1, window_size, window_size, C)
    xr = window_reverse(yw, window_size, H, W)
    if shift_size > 0:
        xr = jnp.roll(xr, shift=(shift_size, shift_size), axis=(1, 2))
    x = xr.reshape(B, L, C)            # == shortcut + attn-branch
    x = mlp_pallas(x, p)               # x + MLP(LN2(x)) fused in kernel
    return x


def basic_layer_forward(x, block_params, block_cfgs, input_resolution, num_heads):
    H, W = input_resolution
    in_dtype = x.dtype
    x = x.astype(jnp.bfloat16)         # inter-kernel activations & glue in bf16
    for p, (ws, shift, mask) in zip(block_params, block_cfgs):
        x = swin_block_forward(x, p, H, W, ws, shift, num_heads, mask)
    # downsample=None in this configuration
    return x.astype(in_dtype)


# ------------------------------ parameter init ------------------------------
def relative_position_index(ws):
    coords = np.stack(np.meshgrid(np.arange(ws), np.arange(ws), indexing="ij"))
    cf = coords.reshape(2, -1)
    rel = cf[:, :, None] - cf[:, None, :]
    rel = rel.transpose(1, 2, 0).astype(np.int64)
    rel[:, :, 0] += ws - 1
    rel[:, :, 1] += ws - 1
    rel[:, :, 0] *= 2 * ws - 1
    return rel.sum(-1)                                           # (N, N)


def compute_attn_mask(H, W, ws, shift):
    if shift == 0:
        return None
    N = ws * ws
    img_mask = np.zeros((1, H, W, 1), np.float32)
    slices = (slice(0, -ws), slice(-ws, -shift), slice(-shift, None))
    cnt = 0
    for hs in slices:
        for wsl in slices:
            img_mask[:, hs, wsl, :] = cnt
            cnt += 1
    mw = img_mask.reshape(1, H // ws, ws, W // ws, ws, 1)
    mw = mw.transpose(0, 1, 3, 2, 4, 5).reshape(-1, N)
    am = mw[:, None, :] - mw[:, :, None]
    am = np.where(am != 0, -100.0, 0.0).astype(np.float32)
    return jnp.asarray(am)                                       # (nW, N, N)


def init_block_params(key, dim, num_heads, window_size, mlp_ratio):
    N = window_size * window_size
    hidden = int(dim * mlp_ratio)
    head_dim = dim // num_heads
    scale = head_dim ** (-0.5)
    ks = jax.random.split(key, 6)
    std = 0.02
    # relative position bias (precomputed gather -> (num_heads, N, N))
    table = std * jax.random.normal(
        ks[0], ((2 * window_size - 1) ** 2, num_heads), jnp.float32)
    rpi = relative_position_index(window_size)
    rel_bias = table[rpi.reshape(-1)].reshape(N, N, num_heads).transpose(2, 0, 1)
    # fold the 1/sqrt(head_dim) q-scale into the q rows of Wqkv / bqkv so the
    # kernel never multiplies q by scale (mathematically identical).
    wqkv = std * jax.random.normal(ks[1], (dim, 3 * dim), jnp.float32)
    wqkv = wqkv.at[:, :dim].multiply(scale)
    bqkv = jnp.zeros((1, 3 * dim), jnp.float32)
    bqkv = bqkv.at[:, :dim].multiply(scale)
    return dict(
        g1=jnp.ones((1, dim), jnp.float32),
        be1=jnp.zeros((1, dim), jnp.float32),
        wqkv=wqkv.astype(jnp.bfloat16),
        bqkv=bqkv,
        wproj=(std * jax.random.normal(ks[2], (dim, dim), jnp.float32)
               ).astype(jnp.bfloat16),
        bproj=jnp.zeros((1, dim), jnp.float32),
        rel_bias=rel_bias,                                       # (H, N, N) f32
        g2=jnp.ones((1, dim), jnp.float32),
        be2=jnp.zeros((1, dim), jnp.float32),
        w1=(std * jax.random.normal(ks[3], (dim, hidden), jnp.float32)
            ).astype(jnp.bfloat16),
        b1=jnp.zeros((1, hidden), jnp.float32),
        w2=(std * jax.random.normal(ks[4], (hidden, dim), jnp.float32)
            ).astype(jnp.bfloat16),
        b2=jnp.zeros((1, dim), jnp.float32),
    )


# ----------------------------------- main -----------------------------------
if __name__ == "__main__":
    # BasicLayer config (small, but exercises both shifted and non-shifted blocks)
    B = 2
    H = W = 8
    dim = 32
    depth = 2
    num_heads = 4
    window_size = 4
    mlp_ratio = 4.0
    input_resolution = (H, W)

    key = jax.random.PRNGKey(0)
    kx, *bkeys = jax.random.split(key, depth + 1)

    block_params = []
    block_cfgs = []
    for i in range(depth):
        shift = 0 if i % 2 == 0 else window_size // 2
        ws = window_size
        # SwinTransformerBlock: clamp window / drop shift if resolution too small
        if min(input_resolution) <= ws:
            shift = 0
            ws = min(input_resolution)
        block_params.append(init_block_params(bkeys[i], dim, num_heads, ws, mlp_ratio))
        block_cfgs.append((ws, shift, compute_attn_mask(H, W, ws, shift)))

    x = jax.random.normal(kx, (B, H * W, dim), jnp.float32)

    out = basic_layer_forward(x, block_params, block_cfgs, input_resolution, num_heads)
    out = jax.block_until_ready(out)
    assert out.shape == (B, H * W, dim) and bool(jnp.all(jnp.isfinite(out)))
    print("KERNEL_OK")
</pallas_src>

<mosaic_0001>
module attributes {stable_mosaic.version = 11 : i64} {
  func.func @k(%arg0: i32, %arg1: memref<8x128xf32, #tpu.memory_space<vmem>>, %arg2: memref<8x128xf32, #tpu.memory_space<vmem>>, %arg3: memref<8x128xf32, #tpu.memory_space<vmem>>) attributes {dimension_semantics = [#tpu.dimension_semantics<arbitrary>], iteration_bounds = array<i64: 1>, scalar_prefetch = 0 : i64, scratch_operands = 0 : i64, tpu.core_type = #tpu.core_type<tc>, window_params = [{pipeline_mode = #tpu.pipeline_mode<synchronous>, transform_indices = @transform_0, window_bounds = array<i64: 8, 128>}, {pipeline_mode = #tpu.pipeline_mode<synchronous>, transform_indices = @transform_1, window_bounds = array<i64: 8, 128>}, {pipeline_mode = #tpu.pipeline_mode<synchronous>, transform_indices = @transform_2, window_bounds = array<i64: 8, 128>}]} {
    %c0 = arith.constant 0 : index
    %c0_0 = arith.constant 0 : index
    %0 = vector.load %arg1[%c0, %c0_0] : memref<8x128xf32, #tpu.memory_space<vmem>>, vector<8x128xf32>
    %c0_1 = arith.constant 0 : index
    %c0_2 = arith.constant 0 : index
    %1 = vector.load %arg2[%c0_1, %c0_2] : memref<8x128xf32, #tpu.memory_space<vmem>>, vector<8x128xf32>
    %2 = arith.addf %0, %1 : vector<8x128xf32>
    %c0_3 = arith.constant 0 : index
    %c0_4 = arith.constant 0 : index
    %3 = vector.load %arg3[%c0_3, %c0_4] : memref<8x128xf32, #tpu.memory_space<vmem>>, vector<8x128xf32>
    tpu.vector_store %arg3[%c0_3, %c0_4], %2 {strides = array<i32>} : memref<8x128xf32, #tpu.memory_space<vmem>>, vector<8x128xf32>,
    return
  }
  func.func @transform_0(%arg0: i32) -> (i32, i32) {
    %c0_i32 = arith.constant 0 : i32
    %c0_i32_0 = arith.constant 0 : i32
    %c0_i32_1 = arith.constant 0 : i32
    return %c0_i32, %c0_i32_0 : i32, i32
  }
  func.func @transform_1(%arg0: i32) -> (i32, i32) {
    %c0_i32 = arith.constant 0 : i32
    %c0_i32_0 = arith.constant 0 : i32
    %c0_i32_1 = arith.constant 0 : i32
    return %c0_i32, %c0_i32_0 : i32, i32
  }
  func.func @transform_2(%arg0: i32) -> (i32, i32) {
    %c0_i32 = arith.constant 0 : i32
    %c0_i32_0 = arith.constant 0 : i32
    %c0_i32_1 = arith.constant 0 : i32
    return %c0_i32, %c0_i32_0 : i32, i32
  }
}

module attributes {stable_mosaic.version = 11 : i64} {
  func.func @attn_kernel(%arg0: i32, %arg1: memref<64x32xbf16, #tpu.memory_space<vmem>>, %arg2: memref<32x96xbf16, #tpu.memory_space<vmem>>, %arg3: memref<1x96xf32, #tpu.memory_space<vmem>>, %arg4: memref<32x32xbf16, #tpu.memory_space<vmem>>, %arg5: memref<1x32xf32, #tpu.memory_space<vmem>>, %arg6: memref<1x32xf32, #tpu.memory_space<vmem>>, %arg7: memref<1x32xf32, #tpu.memory_space<vmem>>, %arg8: memref<4x1x16x16xbf16, #tpu.memory_space<vmem>>, %arg9: memref<64x32xbf16, #tpu.memory_space<vmem>>) attributes {dimension_semantics = [#tpu.dimension_semantics<parallel>], iteration_bounds = array<i64: 2>, scalar_prefetch = 0 : i64, scratch_operands = 0 : i64, tpu.core_type = #tpu.core_type<tc>, window_params = [{transform_indices = @transform_0, window_bounds = array<i64: 64, 32>}, {pipeline_mode = #tpu.pipeline_mode<synchronous>, transform_indices = @transform_1, window_bounds = array<i64: 32, 96>}, {pipeline_mode = #tpu.pipeline_mode<synchronous>, transform_indices = @transform_2, window_bounds = array<i64: 1, 96>}, {pipeline_mode = #tpu.pipeline_mode<synchronous>, transform_indices = @transform_3, window_bounds = array<i64: 32, 32>}, {pipeline_mode = #tpu.pipeline_mode<synchronous>, transform_indices = @transform_4, window_bounds = array<i64: 1, 32>}, {pipeline_mode = #tpu.pipeline_mode<synchronous>, transform_indices = @transform_5, window_bounds = array<i64: 1, 32>}, {pipeline_mode = #tpu.pipeline_mode<synchronous>, transform_indices = @transform_6, window_bounds = array<i64: 1, 32>}, {pipeline_mode = #tpu.pipeline_mode<synchronous>, transform_indices = @transform_7, window_bounds = array<i64: 4, 1, 16, 16>}, {transform_indices = @transform_8, window_bounds = array<i64: 64, 32>}]} {
    %c0 = arith.constant 0 : index
    %c0_0 = arith.constant 0 : index
    %0 = vector.load %arg1[%c0, %c0_0] : memref<64x32xbf16, #tpu.memory_space<vmem>>, vector<64x32xbf16>
    %1 = arith.extf %0 : vector<64x32xbf16> to vector<64x32xf32>
    %c0_1 = arith.constant 0 : index
    %c0_2 = arith.constant 0 : index
    %2 = vector.load %arg6[%c0_1, %c0_2] : memref<1x32xf32, #tpu.memory_space<vmem>>, vector<1x32xf32>
    %3 = vector.shape_cast %2 : vector<1x32xf32> to vector<32xf32>
    %c0_3 = arith.constant 0 : index
    %c0_4 = arith.constant 0 : index
    %4 = vector.load %arg7[%c0_3, %c0_4] : memref<1x32xf32, #tpu.memory_space<vmem>>, vector<1x32xf32>
    %5 = vector.shape_cast %4 : vector<1x32xf32> to vector<32xf32>
    %cst = arith.constant dense<0.000000e+00> : vector<64xf32>
    %6 = vector.multi_reduction <add>, %1, %cst [1] : vector<64x32xf32> to vector<64xf32>
    %7 = vector.shape_cast %6 : vector<64xf32> to vector<64x1xf32>
    %cst_5 = arith.constant 3.200000e+01 : f32
    %8 = vector.broadcast %cst_5 : f32 to vector<64x1xf32>
    %9 = arith.divf %7, %8 : vector<64x1xf32>
    %10 = vector.broadcast %9 : vector<64x1xf32> to vector<64x32xf32>
    %11 = arith.subf %1, %10 : vector<64x32xf32>
    %12 = arith.mulf %11, %11 : vector<64x32xf32>
    %cst_6 = arith.constant dense<0.000000e+00> : vector<64xf32>
    %13 = vector.multi_reduction <add>, %12, %cst_6 [1] : vector<64x32xf32> to vector<64xf32>
    %14 = vector.shape_cast %13 : vector<64xf32> to vector<64x1xf32>
    %cst_7 = arith.constant 3.200000e+01 : f32
    %15 = vector.broadcast %cst_7 : f32 to vector<64x1xf32>
    %16 = arith.divf %14, %15 : vector<64x1xf32>
    %17 = vector.broadcast %9 : vector<64x1xf32> to vector<64x32xf32>
    %18 = arith.subf %1, %17 : vector<64x32xf32>
    %cst_8 = arith.constant 9.99999974E-6 : f32
    %19 = vector.broadcast %cst_8 : f32 to vector<64x1xf32>
    %20 = arith.addf %16, %19 : vector<64x1xf32>
    %21 = math.rsqrt %20 : vector<64x1xf32>
    %22 = vector.broadcast %21 : vector<64x1xf32> to vector<64x32xf32>
    %23 = arith.mulf %18, %22 : vector<64x32xf32>
    %24 = vector.shape_cast %3 : vector<32xf32> to vector<1x32xf32>
    %25 = vector.broadcast %24 : vector<1x32xf32> to vector<64x32xf32>
    %26 = arith.mulf %23, %25 : vector<64x32xf32>
    %27 = vector.shape_cast %5 : vector<32xf32> to vector<1x32xf32>
    %28 = vector.broadcast %27 : vector<1x32xf32> to vector<64x32xf32>
    %29 = arith.addf %26, %28 : vector<64x32xf32>
    %30 = arith.truncf %29 : vector<64x32xf32> to vector<64x32xbf16>
    %c0_9 = arith.constant 0 : index
    %c0_10 = arith.constant 0 : index
    %31 = vector.load %arg2[%c0_9, %c0_10] : memref<32x96xbf16, #tpu.memory_space<vmem>>, vector<32x96xbf16>
    %cst_11 = arith.constant dense<0.000000e+00> : vector<64x96xf32>
    %32 = tpu.matmul %30, %31, %cst_11 {dimension_numbers = #tpu.dot_dimension_numbers<[1], [0], [0], [1], [0, 0, 1, 1], [], []>} : vector<64x32xbf16>, vector<32x96xbf16>, vector<64x96xf32> -> vector<64x96xf32>
    %c0_12 = arith.constant 0 : index
    %c0_13 = arith.constant 0 : index
    %33 = vector.load %arg3[%c0_12, %c0_13] : memref<1x96xf32, #tpu.memory_space<vmem>>, vector<1x96xf32>
    %34 = vector.shape_cast %33 : vector<1x96xf32> to vector<96xf32>
    %35 = vector.shape_cast %34 : vector<96xf32> to vector<1x96xf32>
    %36 = vector.broadcast %35 : vector<1x96xf32> to vector<64x96xf32>
    %37 = arith.addf %32, %36 : vector<64x96xf32>
    %38 = arith.truncf %37 : vector<64x96xf32> to vector<64x96xbf16>
    %39 = vector.extract_strided_slice %38 {offsets = [0, 0], sizes = [64, 8], strides = [1, 1]} : vector<64x96xbf16> to vector<64x8xbf16>
    %40 = vector.shape_cast %39 : vector<64x8xbf16> to vector<4x16x8xbf16>
    %41 = vector.extract_strided_slice %38 {offsets = [0, 32], sizes = [64, 8], strides = [1, 1]} : vector<64x96xbf16> to vector<64x8xbf16>
    %42 = vector.shape_cast %41 : vector<64x8xbf16> to vector<4x16x8xbf16>
    %43 = vector.extract_strided_slice %38 {offsets = [0, 64], sizes = [64, 8], strides = [1, 1]} : vector<64x96xbf16> to vector<64x8xbf16>
    %44 = vector.shape_cast %43 : vector<64x8xbf16> to vector<4x16x8xbf16>
    "tpu.trace_start"() <{level = 10 : i32, message = "wqd,wkd->wqk"}> : () -> ()
    %cst_14 = arith.constant dense<0.000000e+00> : vector<4x16x16xf32>
    %45 = tpu.matmul %40, %42, %cst_14 {dimension_numbers = #tpu.dot_dimension_numbers<[2], [2], [1], [1], [0, 0, 0, 1, 1, 1], [0], [0]>} : vector<4x16x8xbf16>, vector<4x16x8xbf16>, vector<4x16x16xf32> -> vector<4x16x16xf32>
    "tpu.trace_stop"() : () -> ()
    %c0_15 = arith.constant 0 : index
    %c0_16 = arith.constant 0 : index
    %c0_17 = arith.constant 0 : index
    %c0_18 = arith.constant 0 : index
    %46 = vector.load %arg8[%c0_15, %c0_16, %c0_17, %c0_18] : memref<4x1x16x16xbf16, #tpu.memory_space<vmem>>, vector<1x1x16x16xbf16>
    %47 = vector.shape_cast %46 : vector<1x1x16x16xbf16> to vector<1x16x16xbf16>
    %48 = arith.extf %47 : vector<1x16x16xbf16> to vector<1x16x16xf32>
    %49 = vector.broadcast %48 : vector<1x16x16xf32> to vector<4x16x16xf32>
    %50 = arith.addf %45, %49 : vector<4x16x16xf32>
    %cst_19 = arith.constant dense<0xFF800000> : vector<4x16xf32>
    %51 = vector.multi_reduction <maximumf>, %50, %cst_19 [2] : vector<4x16x16xf32> to vector<4x16xf32>
    %52 = vector.shape_cast %51 : vector<4x16xf32> to vector<4x16x1xf32>
    %53 = vector.broadcast %52 : vector<4x16x1xf32> to vector<4x16x16xf32>
    %54 = arith.subf %50, %53 : vector<4x16x16xf32>
    %55 = math.exp %54 : vector<4x16x16xf32>
    %cst_20 = arith.constant dense<0.000000e+00> : vector<4x16xf32>
    %56 = vector.multi_reduction <add>, %55, %cst_20 [2] : vector<4x16x16xf32> to vector<4x16xf32>
    %57 = vector.shape_cast %56 : vector<4x16xf32> to vector<4x16x1xf32>
    %58 = tpu.reciprocal %57 {approx = true} : vector<4x16x1xf32> -> vector<4x16x1xf32>
    %59 = vector.broadcast %58 : vector<4x16x1xf32> to vector<4x16x16xf32>
    %60 = arith.mulf %55, %59 : vector<4x16x16xf32>
    %61 = arith.truncf %60 : vector<4x16x16xf32> to vector<4x16x16xbf16>
    "tpu.trace_start"() <{level = 10 : i32, message = "wqk,wkd->wqd"}> : () -> ()
    %cst_21 = arith.constant dense<0.000000e+00> : vector<4x16x8xf32>
    %62 = tpu.matmul %61, %44, %cst_21 {dimension_numbers = #tpu.dot_dimension_numbers<[2], [1], [1], [2], [0, 0, 0, 1, 1, 2], [0], [0]>} : vector<4x16x16xbf16>, vector<4x16x8xbf16>, vector<4x16x8xf32> -> vector<4x16x8xf32>
    "tpu.trace_stop"() : () -> ()
    %63 = vector.shape_cast %62 : vector<4x16x8xf32> to vector<64x8xf32>
    %64 = arith.truncf %63 : vector<64x8xf32> to vector<64x8xbf16>
    %c0_22 = arith.constant 0 : index
    %c0_23 = arith.constant 0 : index
    %65 = vector.load %arg4[%c0_22, %c0_23] : memref<32x32xbf16, #tpu.memory_space<vmem>>, vector<8x32xbf16>
    %cst_24 = arith.constant dense<0.000000e+00> : vector<64x32xf32>
    %66 = tpu.matmul %64, %65, %cst_24 {dimension_numbers = #tpu.dot_dimension_numbers<[1], [0], [0], [1], [0, 0, 1, 1], [], []>} : vector<64x8xbf16>, vector<8x32xbf16>, vector<64x32xf32> -> vector<64x32xf32>
    %67 = arith.addf %1, %66 : vector<64x32xf32>
    %68 = vector.extract_strided_slice %38 {offsets = [0, 8], sizes = [64, 8], strides = [1, 1]} : vector<64x96xbf16> to vector<64x8xbf16>
    %69 = vector.shape_cast %68 : vector<64x8xbf16> to vector<4x16x8xbf16>
    %70 = vector.extract_strided_slice %38 {offsets = [0, 40], sizes = [64, 8], strides = [1, 1]} : vector<64x96xbf16> to vector<64x8xbf16>
    %71 = vector.shape_cast %70 : vector<64x8xbf16> to vector<4x16x8xbf16>
    %72 = vector.extract_strided_slice %38 {offsets = [0, 72], sizes = [64, 8], strides = [1, 1]} : vector<64x96xbf16> to vector<64x8xbf16>
    %73 = vector.shape_cast %72 : vector<64x8xbf16> to vector<4x16x8xbf16>
    "tpu.trace_start"() <{level = 10 : i32, message = "wqd,wkd->wqk"}> : () -> ()
    %cst_25 = arith.constant dense<0.000000e+00> : vector<4x16x16xf32>
    %74 = tpu.matmul %69, %71, %cst_25 {dimension_numbers = #tpu.dot_dimension_numbers<[2], [2], [1], [1], [0, 0, 0, 1, 1, 1], [0], [0]>} : vector<4x16x8xbf16>, vector<4x16x8xbf16>, vector<4x16x16xf32> -> vector<4x16x16xf32>
    "tpu.trace_stop"() : () -> ()
    %c1 = arith.constant 1 : index
    %c0_26 = arith.constant 0 : index
    %c0_27 = arith.constant 0 : index
    %c0_28 = arith.constant 0 : index
    %75 = vector.load %arg8[%c1, %c0_26, %c0_27, %c0_28] : memref<4x1x16x16xbf16, #tpu.memory_space<vmem>>, vector<1x1x16x16xbf16>
    %76 = vector.shape_cast %75 : vector<1x1x16x16xbf16> to vector<1x16x16xbf16>
    %77 = arith.extf %76 : vector<1x16x16xbf16> to vector<1x16x16xf32>
    %78 = vector.broadcast %77 : vector<1x16x16xf32> to vector<4x16x16xf32>
    %79 = arith.addf %74, %78 : vector<4x16x16xf32>
    %cst_29 = arith.constant dense<0xFF800000> : vector<4x16xf32>
    %80 = vector.multi_reduction <maximumf>, %79, %cst_29 [2] : vector<4x16x16xf32> to vector<4x16xf32>
    %81 = vector.shape_cast %80 : vector<4x16xf32> to vector<4x16x1xf32>
    %82 = vector.broadcast %81 : vector<4x16x1xf32> to vector<4x16x16xf32>
    %83 = arith.subf %79, %82 : vector<4x16x16xf32>
    %84 = math.exp %83 : vector<4x16x16xf32>
    %cst_30 = arith.constant dense<0.000000e+00> : vector<4x16xf32>
    %85 = vector.multi_reduction <add>, %84, %cst_30 [2] : vector<4x16x16xf32> to vector<4x16xf32>
    %86 = vector.shape_cast %85 : vector<4x16xf32> to vector<4x16x1xf32>
    %87 = tpu.reciprocal %86 {approx = true} : vector<4x16x1xf32> -> vector<4x16x1xf32>
    %88 = vector.broadcast %87 : vector<4x16x1xf32> to vector<4x16x16xf32>
    %89 = arith.mulf %84, %88 : vector<4x16x16xf32>
    %90 = arith.truncf %89 : vector<4x16x16xf32> to vector<4x16x16xbf16>
    "tpu.trace_start"() <{level = 10 : i32, message = "wqk,wkd->wqd"}> : () -> ()
    %cst_31 = arith.constant dense<0.000000e+00> : vector<4x16x8xf32>
    %91 = tpu.matmul %90, %73, %cst_31 {dimension_numbers = #tpu.dot_dimension_numbers<[2], [1], [1], [2], [0, 0, 0, 1, 1, 2], [0], [0]>} : vector<4x16x16xbf16>, vector<4x16x8xbf16>, vector<4x16x8xf32> -> vector<4x16x8xf32>
    "tpu.trace_stop"() : () -> ()
    %92 = vector.shape_cast %91 : vector<4x16x8xf32> to vector<64x8xf32>
    %93 = arith.truncf %92 : vector<64x8xf32> to vector<64x8xbf16>
    %c8 = arith.constant 8 : index
    %c0_32 = arith.constant 0 : index
    %94 = vector.load %arg4[%c8, %c0_32] : memref<32x32xbf16, #tpu.memory_space<vmem>>, vector<8x32xbf16>
    %cst_33 = arith.constant dense<0.000000e+00> : vector<64x32xf32>
    %95 = tpu.matmul %93, %94, %cst_33 {dimension_numbers = #tpu.dot_dimension_numbers<[1], [0], [0], [1], [0, 0, 1, 1], [], []>} : vector<64x8xbf16>, vector<8x32xbf16>, vector<64x32xf32> -> vector<64x32xf32>
    %96 = arith.addf %67, %95 : vector<64x32xf32>
    %97 = vector.extract_strided_slice %38 {offsets = [0, 16], sizes = [64, 8], strides = [1, 1]} : vector<64x96xbf16> to vector<64x8xbf16>
    %98 = vector.shape_cast %97 : vector<64x8xbf16> to vector<4x16x8xbf16>
    %99 = vector.extract_strided_slice %38 {offsets = [0, 48], sizes = [64, 8], strides = [1, 1]} : vector<64x96xbf16> to vector<64x8xbf16>
    %100 = vector.shape_cast %99 : vector<64x8xbf16> to vector<4x16x8xbf16>
    %101 = vector.extract_strided_slice %38 {offsets = [0, 80], sizes = [64, 8], strides = [1, 1]} : vector<64x96xbf16> to vector<64x8xbf16>
    %102 = vector.shape_cast %101 : vector<64x8xbf16> to vector<4x16x8xbf16>
    "tpu.trace_start"() <{level = 10 : i32, message = "wqd,wkd->wqk"}> : () -> ()
    %cst_34 = arith.constant dense<0.000000e+00> : vector<4x16x16xf32>
    %103 = tpu.matmul %98, %100, %cst_34 {dimension_numbers = #tpu.dot_dimension_numbers<[2], [2], [1], [1], [0, 0, 0, 1, 1, 1], [0], [0]>} : vector<4x16x8xbf16>, vector<4x16x8xbf16>, vector<4x16x16xf32> -> vector<4x16x16xf32>
    "tpu.trace_stop"() : () -> ()
    %c2 = arith.constant 2 : index
    %c0_35 = arith.constant 0 : index
    %c0_36 = arith.constant 0 : index
    %c0_37 = arith.constant 0 : index
    %104 = vector.load %arg8[%c2, %c0_35, %c0_36, %c0_37] : memref<4x1x16x16xbf16, #tpu.memory_space<vmem>>, vector<1x1x16x16xbf16>
    %105 = vector.shape_cast %104 : vector<1x1x16x16xbf16> to vector<1x16x16xbf16>
    %106 = arith.extf %105 : vector<1x16x16xbf16> to vector<1x16x16xf32>
    %107 = vector.broadcast %106 : vector<1x16x16xf32> to vector<4x16x16xf32>
    %108 = arith.addf %103, %107 : vector<4x16x16xf32>
    %cst_38 = arith.constant dense<0xFF800000> : vector<4x16xf32>
    %109 = vector.multi_reduction <maximumf>, %108, %cst_38 [2] : vector<4x16x16xf32> to vector<4x16xf32>
    %110 = vector.shape_cast %109 : vector<4x16xf32> to vector<4x16x1xf32>
    %111 = vector.broadcast %110 : vector<4x16x1xf32> to vector<4x16x16xf32>
    %112 = arith.subf %108, %111 : vector<4x16x16xf32>
    %113 = math.exp %112 : vector<4x16x16xf32>
    %cst_39 = arith.constant dense<0.000000e+00> : vector<4x16xf32>
    %114 = vector.multi_reduction <add>, %113, %cst_39 [2] : vector<4x16x16xf32> to vector<4x16xf32>
    %115 = vector.shape_cast %114 : vector<4x16xf32> to vector<4x16x1xf32>
    %116 = tpu.reciprocal %115 {approx = true} : vector<4x16x1xf32> -> vector<4x16x1xf32>
    %117 = vector.broadcast %116 : vector<4x16x1xf32> to vector<4x16x16xf32>
    %118 = arith.mulf %113, %117 : vector<4x16x16xf32>
    %119 = arith.truncf %118 : vector<4x16x16xf32> to vector<4x16x16xbf16>
    "tpu.trace_start"() <{level = 10 : i32, message = "wqk,wkd->wqd"}> : () -> ()
    %cst_40 = arith.constant dense<0.000000e+00> : vector<4x16x8xf32>
    %120 = tpu.matmul %119, %102, %cst_40 {dimension_numbers = #tpu.dot_dimension_numbers<[2], [1], [1], [2], [0, 0, 0, 1, 1, 2], [0], [0]>} : vector<4x16x16xbf16>, vector<4x16x8xbf16>, vector<4x16x8xf32> -> vector<4x16x8xf32>
    "tpu.trace_stop"() : () -> ()
    %121 = vector.shape_cast %120 : vector<4x16x8xf32> to vector<64x8xf32>
    %122 = arith.truncf %121 : vector<64x8xf32> to vector<64x8xbf16>
    %c16 = arith.constant 16 : index
    %c0_41 = arith.constant 0 : index
    %123 = vector.load %arg4[%c16, %c0_41] : memref<32x32xbf16, #tpu.memory_space<vmem>>, vector<8x32xbf16>
    %cst_42 = arith.constant dense<0.000000e+00> : vector<64x32xf32>
    %124 = tpu.matmul %122, %123, %cst_42 {dimension_numbers = #tpu.dot_dimension_numbers<[1], [0], [0], [1], [0, 0, 1, 1], [], []>} : vector<64x8xbf16>, vector<8x32xbf16>, vector<64x32xf32> -> vector<64x32xf32>
    %125 = arith.addf %96, %124 : vector<64x32xf32>
    %126 = vector.extract_strided_slice %38 {offsets = [0, 24], sizes = [64, 8], strides = [1, 1]} : vector<64x96xbf16> to vector<64x8xbf16>
    %127 = vector.shape_cast %126 : vector<64x8xbf16> to vector<4x16x8xbf16>
    %128 = vector.extract_strided_slice %38 {offsets = [0, 56], sizes = [64, 8], strides = [1, 1]} : vector<64x96xbf16> to vector<64x8xbf16>
    %129 = vector.shape_cast %128 : vector<64x8xbf16> to vector<4x16x8xbf16>
    %130 = vector.extract_strided_slice %38 {offsets = [0, 88], sizes = [64, 8], strides = [1, 1]} : vector<64x96xbf16> to vector<64x8xbf16>
    %131 = vector.shape_cast %130 : vector<64x8xbf16> to vector<4x16x8xbf16>
    "tpu.trace_start"() <{level = 10 : i32, message = "wqd,wkd->wqk"}> : () -> ()
    %cst_43 = arith.constant dense<0.000000e+00> : vector<4x16x16xf32>
    %132 = tpu.matmul %127, %129, %cst_43 {dimension_numbers = #tpu.dot_dimension_numbers<[2], [2], [1], [1], [0, 0, 0, 1, 1, 1], [0], [0]>} : vector<4x16x8xbf16>, vector<4x16x8xbf16>, vector<4x16x16xf32> -> vector<4x16x16xf32>
    "tpu.trace_stop"() : () -> ()
    %c3 = arith.constant 3 : index
    %c0_44 = arith.constant 0 : index
    %c0_45 = arith.constant 0 : index
    %c0_46 = arith.constant 0 : index
    %133 = vector.load %arg8[%c3, %c0_44, %c0_45, %c0_46] : memref<4x1x16x16xbf16, #tpu.memory_space<vmem>>, vector<1x1x16x16xbf16>
    %134 = vector.shape_cast %133 : vector<1x1x16x16xbf16> to vector<1x16x16xbf16>
    %135 = arith.extf %134 : vector<1x16x16xbf16> to vector<1x16x16xf32>
    %136 = vector.broadcast %135 : vector<1x16x16xf32> to vector<4x16x16xf32>
    %137 = arith.addf %132, %136 : vector<4x16x16xf32>
    %cst_47 = arith.constant dense<0xFF800000> : vector<4x16xf32>
    %138 = vector.multi_reduction <maximumf>, %137, %cst_47 [2] : vector<4x16x16xf32> to vector<4x16xf32>
    %139 = vector.shape_cast %138 : vector<4x16xf32> to vector<4x16x1xf32>
    %140 = vector.broadcast %139 : vector<4x16x1xf32> to vector<4x16x16xf32>
    %141 = arith.subf %137, %140 : vector<4x16x16xf32>
    %142 = math.exp %141 : vector<4x16x16xf32>
    %cst_48 = arith.constant dense<0.000000e+00> : vector<4x16xf32>
    %143 = vector.multi_reduction <add>, %142, %cst_48 [2] : vector<4x16x16xf32> to vector<4x16xf32>
    %144 = vector.shape_cast %143 : vector<4x16xf32> to vector<4x16x1xf32>
    %145 = tpu.reciprocal %144 {approx = true} : vector<4x16x1xf32> -> vector<4x16x1xf32>
    %146 = vector.broadcast %145 : vector<4x16x1xf32> to vector<4x16x16xf32>
    %147 = arith.mulf %142, %146 : vector<4x16x16xf32>
    %148 = arith.truncf %147 : vector<4x16x16xf32> to vector<4x16x16xbf16>
    "tpu.trace_start"() <{level = 10 : i32, message = "wqk,wkd->wqd"}> : () -> ()
    %cst_49 = arith.constant dense<0.000000e+00> : vector<4x16x8xf32>
    %149 = tpu.matmul %148, %131, %cst_49 {dimension_numbers = #tpu.dot_dimension_numbers<[2], [1], [1], [2], [0, 0, 0, 1, 1, 2], [0], [0]>} : vector<4x16x16xbf16>, vector<4x16x8xbf16>, vector<4x16x8xf32> -> vector<4x16x8xf32>
    "tpu.trace_stop"() : () -> ()
    %150 = vector.shape_cast %149 : vector<4x16x8xf32> to vector<64x8xf32>
    %151 = arith.truncf %150 : vector<64x8xf32> to vector<64x8xbf16>
    %c24 = arith.constant 24 : index
    %c0_50 = arith.constant 0 : index
    %152 = vector.load %arg4[%c24, %c0_50] : memref<32x32xbf16, #tpu.memory_space<vmem>>, vector<8x32xbf16>
    %cst_51 = arith.constant dense<0.000000e+00> : vector<64x32xf32>
    %153 = tpu.matmul %151, %152, %cst_51 {dimension_numbers = #tpu.dot_dimension_numbers<[1], [0], [0], [1], [0, 0, 1, 1], [], []>} : vector<64x8xbf16>, vector<8x32xbf16>, vector<64x32xf32> -> vector<64x32xf32>
    %154 = arith.addf %125, %153 : vector<64x32xf32>
    %c0_52 = arith.constant 0 : index
    %c0_53 = arith.constant 0 : index
    %155 = vector.load %arg5[%c0_52, %c0_53] : memref<1x32xf32, #tpu.memory_space<vmem>>, vector<1x32xf32>
    %156 = vector.shape_cast %155 : vector<1x32xf32> to vector<32xf32>
    %157 = vector.shape_cast %156 : vector<32xf32> to vector<1x32xf32>
    %158 = vector.broadcast %157 : vector<1x32xf32> to vector<64x32xf32>
    %159 = arith.addf %154, %158 : vector<64x32xf32>
    %160 = arith.truncf %159 : vector<64x32xf32> to vector<64x32xbf16>
    %c0_54 = arith.constant 0 : index
    %c0_55 = arith.constant 0 : index
    %161 = vector.load %arg9[%c0_54, %c0_55] : memref<64x32xbf16, #tpu.memory_space<vmem>>, vector<64x32xbf16>
    tpu.vector_store %arg9[%c0_54, %c0_55], %160 {strides = array<i32>} : memref<64x32xbf16, #tpu.memory_space<vmem>>, vector<64x32xbf16>,
    return
  }
  func.func @transform_0(%arg0: i32) -> (i32, i32) {
    %c0_i32 = arith.constant 0 : i32
    %c0_i32_0 = arith.constant 0 : i32
    return %arg0, %c0_i32 : i32, i32
  }
  func.func @transform_1(%arg0: i32) -> (i32, i32) {
    %c0_i32 = arith.constant 0 : i32
    %c0_i32_0 = arith.constant 0 : i32
    %c0_i32_1 = arith.constant 0 : i32
    return %c0_i32, %c0_i32_0 : i32, i32
  }
  func.func @transform_2(%arg0: i32) -> (i32, i32) {
    %c0_i32 = arith.constant 0 : i32
    %c0_i32_0 = arith.constant 0 : i32
    %c0_i32_1 = arith.constant 0 : i32
    return %c0_i32, %c0_i32_0 : i32, i32
  }
  func.func @transform_3(%arg0: i32) -> (i32, i32) {
    %c0_i32 = arith.constant 0 : i32
    %c0_i32_0 = arith.constant 0 : i32
    %c0_i32_1 = arith.constant 0 : i32
    return %c0_i32, %c0_i32_0 : i32, i32
  }
  func.func @transform_4(%arg0: i32) -> (i32, i32) {
    %c0_i32 = arith.constant 0 : i32
    %c0_i32_0 = arith.constant 0 : i32
    %c0_i32_1 = arith.constant 0 : i32
    return %c0_i32, %c0_i32_0 : i32, i32
  }
  func.func @transform_5(%arg0: i32) -> (i32, i32) {
    %c0_i32 = arith.constant 0 : i32
    %c0_i32_0 = arith.constant 0 : i32
    %c0_i32_1 = arith.constant 0 : i32
    return %c0_i32, %c0_i32_0 : i32, i32
  }
  func.func @transform_6(%arg0: i32) -> (i32, i32) {
    %c0_i32 = arith.constant 0 : i32
    %c0_i32_0 = arith.constant 0 : i32
    %c0_i32_1 = arith.constant 0 : i32
    return %c0_i32, %c0_i32_0 : i32, i32
  }
  func.func @transform_7(%arg0: i32) -> (i32, i32, i32, i32) {
    %c0_i32 = arith.constant 0 : i32
    %c0_i32_0 = arith.constant 0 : i32
    %c0_i32_1 = arith.constant 0 : i32
    %c0_i32_2 = arith.constant 0 : i32
    %c0_i32_3 = arith.constant 0 : i32
    return %c0_i32, %c0_i32_0, %c0_i32_1, %c0_i32_2 : i32, i32, i32, i32
  }
  func.func @transform_8(%arg0: i32) -> (i32, i32) {
    %c0_i32 = arith.constant 0 : i32
    %c0_i32_0 = arith.constant 0 : i32
    return %arg0, %c0_i32 : i32, i32
  }
}

</mosaic_0001>

<bundles_post_ra>
// kernel: tpu_custom_call.1
= control target key start
LH: loop header
LB: loop body
LE: loop exit
PB: predicated region body
PF: predicated region fallthrough
CT: control target
= control target key end

     0   :  { %7 = vsyncpa [#allocation3], 0  ;;  %s185_s0 = inlined_call_operand.hbm [shape: f32[8,128], index: 0, kind: input, shape index: {}]   ;;  %s186_s1 = inlined_call_operand.hbm [shape: f32[8,128], index: 1, kind: input, shape index: {}]   ;;  %s187_s2 = inlined_call_operand.hbm [shape: f32[8,128], index: 2, kind: output, shape index: {}]  }
   0x1   :  { %8 = vsyncpa [#allocation6], 0 }
   0x2   :  { %9 = vsyncpa [#allocation4], 0  ;;  %s131_s9 = smov [#allocation2]   ;;  %s132_s11 = smov [#allocation5]  }
   0x3   :  { %s16_s10 = sshll.u32 %s131_s9, 4  ;;  %s26_s12 = sshll.u32 %s132_s11, 4  ;;  %s17_s10 = int_to_ptr.vmem [resolvable:$true] %s16_s10  ;;  %s27_s12 = int_to_ptr.vmem [resolvable:$true] %s26_s12 }
   0x4   :  { %s59_s15 = scalar_lea.hbm %s185_s0, 128 }
   0x5   :  { %p60_p0 = scmp.ne.s32.totalorder %s185_s0, %s59_s15  ;;  %p63_p1 = scmp.lt.u32.totalorder %s59_s15, %s185_s0 }
   0x7   :  { %p65_p2 = pnand %p63_p1, %p60_p0 }
   0x9   :  { %68 = shalt.err (!%p65_p2)
}
   0xa   :  { %s69_s20 = scalar_lea.vmem %s17_s10, 128  ;;  %p74_p4 = scmp.lt.s32.totalorder %s17_s10, %s17_s10 }
   0xb   :  { %p70_p3 = scmp.ne.s32.totalorder %s17_s10, %s69_s20  ;;  %p75_p5 = scmp.lt.s32.totalorder %s69_s20, %s69_s20 }
   0xd   :  { %p76_p6 = por %p75_p5, %p74_p4 }
   0xf   :  { %p77_p7 = pnand %p76_p6, %p70_p3 }
  0x11   :  { %80 = shalt.err (!%p77_p7)
}
  0x12   :  { %19 = dma.hbm_to_vmem [thread:$0]  %s185_s0, 128, %s17_s10, [#allocation3]  }
  0x13   :  { %s81_s25 = scalar_lea.hbm %s186_s1, 128 }
  0x14   :  { %p82_p8 = scmp.ne.s32.totalorder %s186_s1, %s81_s25  ;;  %p85_p9 = scmp.lt.u32.totalorder %s81_s25, %s186_s1 }
  0x16   :  { %p87_p10 = pnand %p85_p9, %p82_p8 }
  0x18   :  { %90 = shalt.err (!%p87_p10)
}
  0x19   :  { %s91_s30 = scalar_lea.vmem %s27_s12, 128  ;;  %p96_p12 = scmp.lt.s32.totalorder %s27_s12, %s27_s12 }
  0x1a   :  { %p92_p11 = scmp.ne.s32.totalorder %s27_s12, %s91_s30  ;;  %p97_p13 = scmp.lt.s32.totalorder %s91_s30, %s91_s30 }
  0x1c   :  { %p98_p0 = por %p97_p13, %p96_p12 }
  0x1e   :  { %p99_p1 = pnand %p98_p0, %p92_p11 }
  0x20   :  { %102 = shalt.err (!%p99_p1)
}
  0x21   :  { %29 = dma.hbm_to_vmem [thread:$0]  %s186_s1, 128, %s27_s12, [#allocation6]  }
  0x22   :  { %125 = dma.done.wait [#allocation3], 128  }
  0x23   :  { %126 = vsyncadd [#allocation3], 4294967168 }
  0x24   :  { %127 = dma.done.wait [#allocation6], 128  }
  0x25   :  { %128 = vsyncadd [#allocation6], 4294967168  ;;  %s133_s4 = smov [#allocation7]   ;;  %v36_v0 = vld [vmem:[#allocation2] sm:$0xff]  ;;  %v37_v1 = vld [vmem:[#allocation5] sm:$0xff] }
  0x26   :  { %s46_s5 = sshll.u32 %s133_s4, 4  ;;  %v38_v2 = vadd.f32 %v37_v1, %v36_v0  ;;  %s47_s5 = int_to_ptr.vmem [resolvable:$true] %s46_s5 }
  0x27   :  { %s103_s6 = scalar_lea.vmem %s47_s5, 128  ;;  %p108_p3 = scmp.lt.s32.totalorder %s47_s5, %s47_s5 }
  0x28   :  { %39 = vst [vmem:[#allocation7] sm:$0xff] %v38_v2  ;;  %p104_p2 = scmp.ne.s32.totalorder %s47_s5, %s103_s6  ;;  %p109_p4 = scmp.lt.s32.totalorder %s103_s6, %s103_s6 }
  0x2a   :  { %p110_p5 = por %p109_p4, %p108_p3 }
  0x2c   :  { %p111_p6 = pnand %p110_p5, %p104_p2 }
  0x2e   :  { %114 = shalt.err (!%p111_p6)
}
  0x2f   :  { %s115_s8 = scalar_lea.hbm %s187_s2, 128 }
  0x30   :  { %p116_p7 = scmp.ne.s32.totalorder %s187_s2, %s115_s8  ;;  %p119_p8 = scmp.lt.u32.totalorder %s115_s8, %s187_s2 }
  0x32   :  { %p121_p9 = pnand %p119_p8, %p116_p7 }
  0x34   :  { %124 = shalt.err (!%p121_p9)
}
  0x35   :  { %49 = dma.vmem_to_hbm [thread:$0]  %s47_s5, 128, %s187_s2, [#allocation4]  }
  0x36   :  { %129 = dma.done.wait [#allocation4], 128  }
  0x37   :  { %130 = vsyncadd [#allocation4], 4294967168 }
  0x38   :  { %53 = vsyncpa [#allocation3], 1 }
  0x39   :  { %54 = vsyncpa [#allocation6], 1 }
  0x3a   :  { %55 = vsyncpa [#allocation4], 1 }

// kernel: tpu_custom_call.1
= control target key start
LH: loop header
LB: loop body
LE: loop exit
PB: predicated region body
PF: predicated region fallthrough
CT: control target
= control target key end

     0   :  { %s3744_s27 = smov 0   ;;  %s4300_s0 = inlined_call_operand.vmem [shape: bf16[128,32], index: 0, kind: input, shape index: {}]   ;;  %s4301_s1 = inlined_call_operand.vmem [shape: bf16[32,96], index: 1, kind: input, shape index: {}]   ;;  %s4302_s2 = inlined_call_operand.vmem [shape: f32[1,96], index: 2, kind: input, shape index: {}]   ;;  %s4303_s3 = inlined_call_operand.vmem [shape: bf16[32,32], index: 3, kind: input, shape index: {}]   ;;  %s4304_s4 = inlined_call_operand.vmem [shape: f32[1,32], index: 4, kind: input, shape index: {}]   ;;  %s4305_s5 = inlined_call_operand.vmem [shape: f32[1,32], index: 5, kind: input, shape index: {}]   ;;  %s4306_s6 = inlined_call_operand.vmem [shape: f32[1,32], index: 6, kind: input, shape index: {}]   ;;  %s4307_s7 = inlined_call_operand.vmem [shape: bf16[4,1,16,16], index: 7, kind: input, shape index: {}]   ;;  %s4308_s8 = inlined_call_operand.vmem [shape: bf16[128,32], index: 8, kind: output, shape index: {}]  }
   0x1 LB: > { %s3008_s28 = sadd.s32 4294967295, %s3684_s27   ;;  %p3012_p0 = scmp.ge.s32.totalorder %s3684_s27, 1  ;;  %s3684_s27 = sphi %s3744_s27, %s18_s27  }
   0x2   : > { %p263_p1 = scmp.lt.s32.totalorder %s3684_s27, 3 }
   0x4   : > { %p264_p2 = pnand %p3012_p0, %p263_p1 }
   0x5   : > { %s3013_s29 = sshll.u32 (!%p264_p2), %s3008_s28, 3  ;;  %vm328_vm0 = vcmask (!%p264_p2), 261120   ;;  %v3532_v60 = vld [vmem:[%s4301_s1] sm:$0xff] (!%p264_p2)   ;;  %v3533_v61 = vld [vmem:[%s4301_s1 + $0x8] sm:$0xff] (!%p264_p2)   ;;  %vm3687_vm1 = vmmov (!%p264_p2), 0   ;;  %s3688_s22 = smov (!%p264_p2), 96  }
   0x6   : > { %267 = sbr.rel (%p264_p2) target bundleno = 4177 (0x1051), region = 52  ;;  %p298_p3 = scmp.lt.s32.totalorder (!%p264_p2), %s3013_s29, 15  ;;  %3227 = vmatprep.subr.bf16.mxu0 (!%p264_p2), %v3532_v60  ;;  %3471 = vmatprep.subr.bf16.mxu1 (!%p264_p2), %v3532_v60  ;;  %vm577_vm2 = vcmask (!%p264_p2), 64512   ;;  %vm775_vm3 = vcmask (!%p264_p2), 130048   ;;  %vm1073_vm4 = vcmask (!%p264_p2), 1043456   ;;  %vm2943_vm5 = vcmask (!%p264_p2), 257024  }
   0x7   : > { %3228 = vmatpush3.bf16.msra.mxu0 (!%p264_p2), %v3532_v60  ;;  %3473 = vmatpush3.bf16.msra.mxu1 (!%p264_p2), %v3532_v60  ;;  %s3689_s25 = smov (!%p264_p2), 64   ;;  %s3690_s26 = smov (!%p264_p2), 88  }
   0x8   : > { %3229 = vmatprep.subr.bf16.mxu0 (!%p264_p2), %v3533_v61  ;;  %3472 = vmatprep.subr.bf16.mxu1 (!%p264_p2), %v3533_v61  ;;  %s3691_s28 = smov (!%p264_p2), 120   ;;  %s3692_s13 = smov (!%p264_p2), 56  }
   0x9   : > { %s3693_s14 = smov (!%p264_p2), 80   ;;  %s3694_s15 = smov (!%p264_p2), 112  }
   0xa   : > { %s3695_s20 = smov (!%p264_p2), 48   ;;  %s3696_s21 = smov (!%p264_p2), 72  }
   0xb   : > { %3230 = vmatpush3.bf16.msra.mxu0 (!%p264_p2), %v3533_v61  ;;  %3474 = vmatpush3.bf16.msra.mxu1 (!%p264_p2), %v3533_v61 }
   0xd   : > { %s4310_s29 = smov (!%p298_p3, %s3013_s29), 15 }
   0xe   : > { %s3014_s30 = sshll.u32 %s4310_s29, 2 }
   0xf   : > { %s301_s11 = scalar_lea.vmem %s4300_s0, %s3014_s30 }
  0x10   : > { %v3100_v0 = vld [vmem:[%s301_s11] sm:$0xff]   ;;  %v3131_v1 = vld [vmem:[%s301_s11 + $0x8] sm:$0xff]   ;;  %v3132_v6 = vld [vmem:[%s301_s11 + $0x10] sm:$0xff]  }
  0x11   : > { %v3760_v2 = vunpack.c.l.bf16 %v3100_v0  ;;  %v3762_v3 = vunpack.c.l.bf16 %v3131_v1  ;;  %v3764_v4 = vunpack.c.h.bf16 %v3100_v0  ;;  %v3766_v5 = vunpack.c.h.bf16 %v3131_v1  ;;  %v3133_v13 = vld [vmem:[%s301_s11 + $0x18] sm:$0xff]  }
  0x12   : > { %v3776_v11 = vunpack.c.l.bf16 %v3132_v6  ;;  %v3778_v12 = vunpack.c.h.bf16 %v3132_v6  ;;  %v3784_v16 = vunpack.c.l.bf16 %v3133_v13  ;;  %v3786_v17 = vunpack.c.h.bf16 %v3133_v13 }
  0x13   : > { %v329_v7 = vsel %vm328_vm0, %v3760_v2, 0.0  ;;  %v335_v8 = vsel %vm328_vm0, %v3762_v3, 0.0  ;;  %v332_v9 = vsel %vm328_vm0, %v3764_v4, 0.0  ;;  %v338_v10 = vsel %vm328_vm0, %v3766_v5, 0.0 }
  0x14   : > { %330 = vadd.xlane.f32.xlu0 %v329_v7  ;;  %336 = vadd.xlane.f32.xlu1 %v335_v8  ;;  %v341_v14 = vsel %vm328_vm0, %v3776_v11, 0.0  ;;  %v344_v15 = vsel %vm328_vm0, %v3778_v12, 0.0  ;;  %v347_v18 = vsel %vm328_vm0, %v3784_v16, 0.0  ;;  %v350_v19 = vsel %vm328_vm0, %v3786_v17, 0.0 }
  0x18   : > { %333 = vadd.xlane.f32.xlu0 %v332_v9  ;;  %339 = vadd.xlane.f32.xlu1 %v338_v10 }
  0x1c   : > { %342 = vadd.xlane.f32.xlu0 %v341_v14  ;;  %345 = vadd.xlane.f32.xlu1 %v344_v15 }
  0x20   : > { %348 = vadd.xlane.f32.xlu0 %v347_v18  ;;  %351 = vadd.xlane.f32.xlu1 %v350_v19 }
  0xa1   : > { %v331_v20 = vpop.xlane.xlu0 %330  ;;  %v337_v21 = vpop.xlane.xlu1 %336 }
  0xa2   : > { %v354_v22 = vmul.f32 0.03125, %v331_v20  ;;  %v356_v23 = vmul.f32 0.03125, %v337_v21 }
  0xa4   : > { %v3793_v24 = vsub.f32 %v3760_v2, %v354_v22  ;;  %v3796_v25 = vsub.f32 %v3762_v3, %v356_v23 }
  0xa5   : > { %v334_v26 = vpop.xlane.xlu0 %333  ;;  %v340_v27 = vpop.xlane.xlu1 %339 }
  0xa6   : > { %v355_v28 = vmul.f32 0.03125, %v334_v26  ;;  %v357_v29 = vmul.f32 0.03125, %v340_v27  ;;  %v370_v30 = vmul.f32 %v3793_v24, %v3793_v24  ;;  %v372_v31 = vmul.f32 %v3796_v25, %v3796_v25 }
  0xa8   : > { %v3803_v32 = vsub.f32 %v3764_v4, %v355_v28  ;;  %v3806_v33 = vsub.f32 %v3766_v5, %v357_v29  ;;  %v378_v34 = vsel %vm328_vm0, %v370_v30, 0.0  ;;  %v384_v37 = vsel %vm328_vm0, %v372_v31, 0.0 }
  0xa9   : > { %379 = vadd.xlane.f32.xlu0 %v378_v34  ;;  %v343_v35 = vpop.xlane.xlu0 %342  ;;  %v346_v36 = vpop.xlane.xlu1 %345 }
  0xaa   : > { %v358_v38 = vmul.f32 0.03125, %v343_v35  ;;  %v359_v39 = vmul.f32 0.03125, %v346_v36  ;;  %v371_v40 = vmul.f32 %v3803_v32, %v3803_v32  ;;  %v373_v41 = vmul.f32 %v3806_v33, %v3806_v33  ;;  %v3017_v35 = vld [vmem:[%s4305_s5] ss:$0 sm:$0xff] }
  0xac   : > { %v3815_v42 = vsub.f32 %v3776_v11, %v358_v38  ;;  %v3818_v43 = vsub.f32 %v3778_v12, %v359_v39  ;;  %v381_v44 = vsel %vm328_vm0, %v371_v40, 0.0  ;;  %v387_v47 = vsel %vm328_vm0, %v373_v41, 0.0  ;;  %v3018_v41 = vld [vmem:[%s4306_s6] ss:$0 sm:$0xff] }
  0xad   : > { %385 = vadd.xlane.f32.xlu0 %v384_v37  ;;  %382 = vadd.xlane.f32.xlu1 %v381_v44  ;;  %v349_v45 = vpop.xlane.xlu0 %348  ;;  %v352_v46 = vpop.xlane.xlu1 %351 }
  0xae   : > { %v360_v48 = vmul.f32 0.03125, %v349_v45  ;;  %v361_v49 = vmul.f32 0.03125, %v352_v46  ;;  %v374_v50 = vmul.f32 %v3815_v42, %v3815_v42  ;;  %v375_v51 = vmul.f32 %v3818_v43, %v3818_v43 }
  0xb0   : > { %v3827_v52 = vsub.f32 %v3784_v16, %v360_v48  ;;  %v3830_v53 = vsub.f32 %v3786_v17, %v361_v49  ;;  %v390_v54 = vsel %vm328_vm0, %v374_v50, 0.0  ;;  %v393_v55 = vsel %vm328_vm0, %v375_v51, 0.0 }
  0xb1   : > { %388 = vadd.xlane.f32.xlu1 %v387_v47  ;;  %391 = vadd.xlane.f32.xlu0 %v390_v54 }
  0xb2   : > { %v376_v56 = vmul.f32 %v3827_v52, %v3827_v52  ;;  %v377_v57 = vmul.f32 %v3830_v53, %v3830_v53 }
  0xb4   : > { %v396_v58 = vsel %vm328_vm0, %v376_v56, 0.0  ;;  %v399_v59 = vsel %vm328_vm0, %v377_v57, 0.0 }
  0xb5   : > { %394 = vadd.xlane.f32.xlu1 %v393_v55  ;;  %397 = vadd.xlane.f32.xlu0 %v396_v58 }
  0xb9   : > { %400 = vadd.xlane.f32.xlu1 %v399_v59 }
 0x136   : > { %v380_v62 = vpop.xlane.xlu0 %379 }
 0x137   : > { %v402_v63 = vmul.f32 0.03125, %v380_v62 }
 0x139   : > { %v410_v0 = vadd.f32 1e-05, %v402_v63 }
 0x13a   : > { %v383_v1 = vpop.xlane.xlu1 %382  ;;  %v386_v6 = vpop.xlane.xlu0 %385 }
 0x13b   : > { %3534 = vrsqrt.f32 %v410_v0  ;;  %v403_v7 = vmul.f32 0.03125, %v383_v1  ;;  %v404_v8 = vmul.f32 0.03125, %v386_v6 }
 0x13d   : > { %v411_v9 = vadd.f32 1e-05, %v403_v7  ;;  %v412_v10 = vadd.f32 1e-05, %v404_v8 }
 0x13e   : > { %v389_v13 = vpop.xlane.xlu1 %388  ;;  %v392_v14 = vpop.xlane.xlu0 %391 }
 0x13f   : > { %3536 = vrsqrt.f32 %v411_v9  ;;  %v405_v15 = vmul.f32 0.03125, %v389_v13  ;;  %v406_v18 = vmul.f32 0.03125, %v392_v14 }
 0x140   : > { %3538 = vrsqrt.f32 %v412_v10  ;;  %v3019_v10 = vld [vmem:[%s4302_s2] ss:$0 sm:$0xff] }
 0x141   : > { %v413_v19 = vadd.f32 1e-05, %v405_v15  ;;  %v414_v20 = vadd.f32 1e-05, %v406_v18 }
 0x142   : > { %v395_v21 = vpop.xlane.xlu1 %394  ;;  %v398_v22 = vpop.xlane.xlu0 %397 }
 0x143   : > { %3540 = vrsqrt.f32 %v413_v19  ;;  %v407_v23 = vmul.f32 0.03125, %v395_v21  ;;  %v408_v26 = vmul.f32 0.03125, %v398_v22 }
 0x144   : > { %3542 = vrsqrt.f32 %v414_v20 }
 0x145   : > { %v3535_v27 = vpop.eup %3534  ;;  %v415_v28 = vadd.f32 1e-05, %v407_v23  ;;  %v416_v29 = vadd.f32 1e-05, %v408_v26 }
 0x146   : > { %v401_v30 = vpop.xlane.xlu1 %400  ;;  %v426_v31 = vmul.f32 %v3535_v27, %v3793_v24 }
 0x147   : > { %3544 = vrsqrt.f32 %v415_v28  ;;  %v409_v34 = vmul.f32 0.03125, %v401_v30 }
 0x148   : > { %3546 = vrsqrt.f32 %v416_v29  ;;  %v440_v40 = vmul.f32 %v3017_v35, %v426_v31 }
 0x149   : > { %v3537_v36 = vpop.eup %3536  ;;  %v417_v37 = vadd.f32 1e-05, %v409_v34 }
 0x14a   : > { %v3539_v38 = vpop.eup %3538  ;;  %v427_v39 = vmul.f32 %v3537_v36, %v3803_v32  ;;  %v454_v47 = vadd.f32 %v3018_v41, %v440_v40 }
 0x14b   : > { %3548 = vrsqrt.f32 %v417_v37  ;;  %v428_v24 = vmul.f32 %v3539_v38, %v3796_v25 }
 0x14c   : > { %v441_v44 = vmul.f32 %v3017_v35, %v427_v39 }
 0x14d   : > { %v3541_v45 = vpop.eup %3540  ;;  %v442_v50 = vmul.f32 %v3017_v35, %v428_v24 }
 0x14e   : > { %v3543_v46 = vpop.eup %3542  ;;  %v455_v48 = vadd.f32 %v3018_v41, %v441_v44  ;;  %v429_v49 = vmul.f32 %v3541_v45, %v3806_v33 }
 0x14f   : > { %v430_v51 = vmul.f32 %v3543_v46, %v3815_v42  ;;  %v456_v57 = vadd.f32 %v3018_v41, %v442_v50 }
 0x150   : > { %v462_v54 = vpack.c.bf16 %v455_v48, %v454_v47  ;;  %v443_v32 = vmul.f32 %v3017_v35, %v429_v49  ;;  %v3116_v47 = vld [vmem:[%s4307_s7] sm:$0xff]  }
 0x151   : > { %v3545_v55 = vpop.eup %3544  ;;  %v444_v59 = vmul.f32 %v3017_v35, %v430_v51  ;;  %v3117_v48 = vunpack.c.l.bf16 %v3116_v47  ;;  %v3118_v49 = vunpack.c.h.bf16 %v3116_v47 }
 0x152   : > { %v3547_v56 = vpop.eup %3546  ;;  %3231 = vmatprep.mubr.msk.bf16.mxu0 %vm328_vm0, %v462_v54  ;;  %v457_v58 = vadd.f32 %v3018_v41, %v443_v32  ;;  %v431_v25 = vmul.f32 %v3545_v55, %v3818_v43 }
 0x153   : > { %v432_v60 = vmul.f32 %v3547_v56, %v3827_v52  ;;  %v458_v33 = vadd.f32 %v3018_v41, %v444_v59  ;;  %v3686_v52 = vmov 0.0  }
 0x154   : > { %v463_v61 = vpack.c.bf16 %v457_v58, %v456_v57  ;;  %v445_v62 = vmul.f32 %v3017_v35, %v431_v25  ;;  %3239 = vmatprep.subr.bf16.mxu1 %v3686_v52  ;;  %3251 = vmatprep.subr.bf16.mxu0 %v3686_v52 }
 0x155   : > { %v3549_v63 = vpop.eup %3548  ;;  %v446_v1 = vmul.f32 %v3017_v35, %v432_v60 }
 0x156   : > { %3232 = vmatmul.mubr.msk.bf16.vlgmr.msra.gmra.mrb[0].mxu0 %vm328_vm0, %v463_v61  ;;  %v459_v42 = vadd.f32 %v3018_v41, %v445_v62  ;;  %v433_v0 = vmul.f32 %v3549_v63, %v3830_v53 }
 0x157   : > { %v460_v8 = vadd.f32 %v3018_v41, %v446_v1  ;;  %3253 = vmatprep.mubr.msk.bf16.mxu0 %vm3687_vm1, %v3686_v52 }
 0x158   : > { %v464_v6 = vpack.c.bf16 %v459_v42, %v458_v33  ;;  %v447_v7 = vmul.f32 %v3017_v35, %v433_v0 }
 0x15a   : > { %3235 = vmatprep.mubr.msk.bf16.mxu1 %vm328_vm0, %v464_v6  ;;  %v461_v9 = vadd.f32 %v3018_v41, %v447_v7 }
 0x15c   : > { %v465_v43 = vpack.c.bf16 %v461_v9, %v460_v8 }
 0x15e   : > { %3236 = vmatmul.mubr.msk.bf16.vlgmr.msra.gmra.mrb[0].mxu1 %vm328_vm0, %v465_v43 }
 0x15f   : > { %3241 = vmatprep.mubr.msk.bf16.mxu1 %vm3687_vm1, %v3686_v52 }
 0x229   : > { %v3233_v53 = vpop.f32.mrb[0].mxu0 }
 0x22a   : > { %v535_v13 = vpop.f32.mrb[1].mxu0  ;;  %v544_v15 = vadd.f32 %v3233_v53, %v3019_v10 }
 0x22b   : > { %v3234_v14 = vpop.f32.mrb[2].mxu0  ;;  %v536_v20 = vadd.f32 %v3019_v10, %v535_v13 }
 0x22c   : > { %v547_v18 = vadd.f32 %v3234_v14, %v3019_v10  ;;  %v538_v19 = vpop.f32.mrb[3].mxu0 }
 0x22d   : > { %v539_v21 = vadd.f32 %v3019_v10, %v538_v19 }
 0x22e   : > { %v3873_v22 = vpack.c.bf16 %v547_v18, %v544_v15 }
 0x22f   : > { %v3875_v23 = vpack.c.bf16 %v539_v21, %v536_v20 }
 0x230   : > { %626 = vrot.lane.b32.xlu1 %v3873_v22, %s3688_s22 }
 0x231   : > { %575 = vrot.lane.b32.xlu0 %v3875_v23, %s3688_s22  ;;  %v3237_v26 = vpop.f32.mrb[0].mxu1 }
 0x232   : > { %v551_v27 = vpop.f32.mrb[1].mxu1  ;;  %v560_v29 = vadd.f32 %v3237_v26, %v3019_v10 }
 0x233   : > { %v3238_v28 = vpop.f32.mrb[2].mxu1  ;;  %v552_v34 = vadd.f32 %v3019_v10, %v551_v27 }
 0x234   : > { %v563_v30 = vadd.f32 %v3238_v28, %v3019_v10  ;;  %v554_v31 = vpop.f32.mrb[3].mxu1 }
 0x235   : > { %v555_v35 = vadd.f32 %v3019_v10, %v554_v31 }
 0x236   : > { %v3879_v36 = vpack.c.bf16 %v563_v30, %v560_v29 }
 0x237   : > { %v3881_v37 = vpack.c.bf16 %v555_v35, %v552_v34 }
 0x239   : > { %676 = vrot.lane.b32.xlu1 %v3881_v37, %s3688_s22 }
 0x23d   : > { %726 = vrot.lane.b32.xlu1 %v3879_v36, %s3688_s22  ;;  %s3697_s22 = smov 104  }
 0x2a2   : > { %v627_v40 = vpop.permute.xlu1 %626 }
 0x2a3   : > { %v576_v38 = vpop.permute.xlu0 %575  ;;  %v632_v24 = vsel %vm577_vm2, %v627_v40, 0 }
 0x2a4   : > { %v582_v39 = vsel %vm577_vm2, %v576_v38, 0 }
 0x2a5   : > { %3240 = vmatpush3.bf16.xpose.msra.mxu1 %v582_v39 }
 0x2a6   : > { %3245 = vmatprep.subr.bf16.mxu1 %v3686_v52 }
 0x2ab   : > { %v677_v41 = vpop.permute.xlu1 %676 }
 0x2ac   : > { %v682_v44 = vsel %vm577_vm2, %v677_v41, 0  ;;  %3242 = vmatmul.mubr.msk.bf16.vlgmr.msra.gmra.mrb[4].mxu1 %vm577_vm2, %v3875_v23 }
 0x2ad   : > { %3246 = vmatpush3.bf16.xpose.msra.mxu1 %v632_v24  ;;  %3252 = vmatpush3.bf16.xpose.msra.mxu0 %v682_v44 }
 0x2ae   : > { %3247 = vmatprep.mubr.msk.bf16.mxu1 %vm3687_vm1, %v3686_v52  ;;  %3257 = vmatprep.subr.bf16.mxu1 %v3686_v52 }
 0x2af   : > { %3263 = vmatprep.subr.bf16.mxu0 %v3686_v52  ;;  %v727_v45 = vpop.permute.xlu1 %726 }
 0x2b0   : > { %v732_v46 = vsel %vm577_vm2, %v727_v45, 0 }
 0x2b4   : > { %3248 = vmatmul.mubr.msk.bf16.vlgmr.msra.gmra.mrb[8].mxu1 %vm577_vm2, %v3873_v22  ;;  %3254 = vmatmul.mubr.msk.bf16.vlgmr.msra.gmra.mrb[4].mxu0 %vm577_vm2, %v3881_v37 }
 0x2b5   : > { %3258 = vmatpush3.bf16.xpose.msra.mxu1 %v732_v46  ;;  %3259 = vmatprep.mubr.msk.bf16.mxu1 %vm3687_vm1, %v3686_v52 }
 0x2b6   : > { %3269 = vmatprep.subr.bf16.mxu1 %v3686_v52  ;;  %3265 = vmatprep.mubr.msk.bf16.mxu0 %vm3687_vm1, %v3686_v52 }
 0x2bc   : > { %3260 = vmatmul.mubr.msk.bf16.vlgmr.msra.gmra.mrb[12].mxu1 %vm577_vm2, %v3879_v36 }
 0x2bd   : > { %3271 = vmatprep.mubr.msk.bf16.mxu1 %vm3687_vm1, %v3686_v52 }
 0x37f   : > { %v618_v50 = vpop.f32.mrb[4].mxu1 }
 0x380   : > { %v619_v51 = vadd.f32 %v3117_v48, %v618_v50  ;;  %v3243_v54 = vpop.f32.mrb[5].mxu1 }
 0x381   : > { %v621_v32 = vpop.f32.mrb[6].mxu1 }
 0x382   : > { %v622_v55 = vadd.f32 %v3118_v49, %v621_v32  ;;  %v3244_v56 = vpop.f32.mrb[7].mxu1  ;;  %v776_v57 = vsel %vm775_vm3, %v619_v51, -inf }
 0x383   : > { %777 = vmax.xlane.f32.xlu0 %v776_v57 }
 0x384   : > { %v779_v58 = vsel %vm775_vm3, %v622_v55, -inf }
 0x385   : > { %780 = vmax.xlane.f32.xlu1 %v779_v58 }
 0x387   : > { %v668_v25 = vpop.f32.mrb[8].mxu1  ;;  %v718_v59 = vpop.f32.mrb[4].mxu0 }
 0x388   : > { %v669_v60 = vadd.f32 %v3117_v48, %v668_v25  ;;  %v3249_v61 = vpop.f32.mrb[9].mxu1  ;;  %v3255_v62 = vpop.f32.mrb[5].mxu0  ;;  %v719_v9 = vadd.f32 %v3117_v48, %v718_v59 }
 0x389   : > { %v671_v63 = vpop.f32.mrb[10].mxu1  ;;  %v721_v33 = vpop.f32.mrb[6].mxu0 }
 0x38a   : > { %v672_v42 = vadd.f32 %v3118_v49, %v671_v63  ;;  %v722_v0 = vadd.f32 %v3118_v49, %v721_v33  ;;  %v3250_v1 = vpop.f32.mrb[11].mxu1  ;;  %v3256_v6 = vpop.f32.mrb[7].mxu0  ;;  %v782_v7 = vsel %vm775_vm3, %v669_v60, -inf  ;;  %v788_v19 = vsel %vm775_vm3, %v719_v9, -inf }
 0x38b   : > { %783 = vmax.xlane.f32.xlu0 %v782_v7 }
 0x38c   : > { %v791_v8 = vsel %vm775_vm3, %v722_v0, -inf  ;;  %v785_v43 = vsel %vm775_vm3, %v672_v42, -inf }
 0x38d   : > { %792 = vmax.xlane.f32.xlu1 %v791_v8 }
 0x38f   : > { %786 = vmax.xlane.f32.xlu0 %v785_v43  ;;  %v768_v53 = vpop.f32.mrb[12].mxu1 }
 0x390   : > { %v3261_v10 = vpop.f32.mrb[13].mxu1  ;;  %v769_v14 = vadd.f32 %v3117_v48, %v768_v53 }
 0x391   : > { %v771_v13 = vpop.f32.mrb[14].mxu1 }
 0x392   : > { %v3917_v15 = vadd.f32 %v3118_v49, %v771_v13  ;;  %v3262_v18 = vpop.f32.mrb[15].mxu1  ;;  %v794_v21 = vsel %vm775_vm3, %v769_v14, -inf }
 0x393   : > { %789 = vmax.xlane.f32.xlu0 %v788_v19 }
 0x394   : > { %v797_v20 = vsel %vm775_vm3, %v3917_v15, -inf }
 0x395   : > { %798 = vmax.xlane.f32.xlu1 %v797_v20 }
 0x397   : > { %795 = vmax.xlane.f32.xlu0 %v794_v21 }
 0x410   : > { %v778_v26 = vpop.xlane.xlu0 %777 }
 0x411   : > { %v800_v27 = vsub.f32 %v619_v51, %v778_v26 }
 0x412   : > { %v781_v28 = vpop.xlane.xlu1 %780 }
 0x413   : > { %v808_v29 = vmul.f32 1.442695, %v800_v27  ;;  %v801_v30 = vsub.f32 %v622_v55, %v781_v28 }
 0x415   : > { %3550 = vpow2.f32 %v808_v29  ;;  %v810_v31 = vmul.f32 1.442695, %v801_v30 }
 0x417   : > { %3552 = vpow2.f32 %v810_v31 }
 0x418   : > { %v784_v34 = vpop.xlane.xlu0 %783 }
 0x419   : > { %v802_v44 = vsub.f32 %v669_v60, %v784_v34  ;;  %v1060_v34 = vld [vmem:[%s4303_s3] sm:$0xf] }
 0x41a   : > { %v793_v35 = vpop.xlane.xlu1 %792 }
 0x41b   : > { %v805_v38 = vsub.f32 %v722_v0, %v793_v35  ;;  %v812_v51 = vmul.f32 1.442695, %v802_v44 }
 0x41c   : > { %v787_v39 = vpop.xlane.xlu0 %786 }
 0x41d   : > { %v818_v40 = vmul.f32 1.442695, %v805_v38  ;;  %v803_v41 = vsub.f32 %v672_v42, %v787_v39 }
 0x41f   : > { %v3923_v24 = vpop.eup %3550  ;;  %3554 = vpow2.f32 %v818_v40  ;;  %v814_v45 = vmul.f32 1.442695, %v803_v41 }
 0x420   : > { %v790_v46 = vpop.xlane.xlu0 %789  ;;  %v824_v47 = vsel %vm775_vm3, %v3923_v24, 0.0 }
 0x421   : > { %v3927_v48 = vpop.eup %3552  ;;  %3556 = vpow2.f32 %v814_v45  ;;  %v804_v49 = vsub.f32 %v719_v9, %v790_v46  ;;  %825 = vadd.xlane.f32.xlu0 %v824_v47 }
 0x422   : > { %v827_v50 = vsel %vm775_vm3, %v3927_v48, 0.0  ;;  %v799_v0 = vpop.xlane.xlu1 %798 }
 0x423   : > { %v816_v54 = vmul.f32 1.442695, %v804_v49  ;;  %828 = vadd.xlane.f32.xlu1 %v827_v50  ;;  %v807_v1 = vsub.f32 %v3917_v15, %v799_v0 }
 0x424   : > { %v796_v32 = vpop.xlane.xlu0 %795 }
 0x425   : > { %3558 = vpow2.f32 %v816_v54  ;;  %v806_v55 = vsub.f32 %v769_v14, %v796_v32  ;;  %v822_v6 = vmul.f32 1.442695, %v807_v1 }
 0x426   : > { %3560 = vpow2.f32 %v812_v51 }
 0x427   : > { %v820_v56 = vmul.f32 1.442695, %v806_v55 }
 0x429   : > { %v3931_v57 = vpop.eup %3554  ;;  %3562 = vpow2.f32 %v820_v56 }
 0x42a   : > { %v839_v58 = vsel %vm775_vm3, %v3931_v57, 0.0  ;;  %3564 = vpow2.f32 %v822_v6 }
 0x42b   : > { %v3935_v25 = vpop.eup %3556  ;;  %840 = vadd.xlane.f32.xlu1 %v839_v58 }
 0x42c   : > { %v833_v59 = vsel %vm775_vm3, %v3935_v25, 0.0 }
 0x42f   : > { %v3939_v60 = vpop.eup %3558  ;;  %834 = vadd.xlane.f32.xlu1 %v833_v59 }
 0x430   : > { %v836_v61 = vsel %vm775_vm3, %v3939_v60, 0.0  ;;  %v3561_v62 = vpop.eup %3560 }
 0x431   : > { %837 = vadd.xlane.f32.xlu0 %v836_v61  ;;  %v830_v63 = vsel %vm775_vm3, %v3561_v62, 0.0 }
 0x433   : > { %v3944_v33 = vpop.eup %3562 }
 0x434   : > { %v842_v42 = vsel %vm775_vm3, %v3944_v33, 0.0  ;;  %v3565_v7 = vpop.eup %3564 }
 0x435   : > { %831 = vadd.xlane.f32.xlu0 %v830_v63  ;;  %v845_v8 = vsel %vm775_vm3, %v3565_v7, 0.0  ;;  %v1075_v63 = vsel %vm1073_vm4, %v1060_v34, 0 }
 0x439   : > { %843 = vadd.xlane.f32.xlu0 %v842_v42 }
 0x440   : > { %915 = vrot.lane.b32.xlu1 %v3873_v22, %s3689_s25 }
 0x444   : > { %962 = vrot.lane.b32.xlu1 %v3881_v37, %s3689_s25 }
 0x44f   : > { %868 = vrot.lane.b32.xlu0 %v3875_v23, %s3689_s25 }
 0x453   : > { %1157 = vrot.lane.b32.xlu0 %v3875_v23, %s3690_s26 }
 0x457   : > { %1208 = vrot.lane.b32.xlu0 %v3873_v22, %s3690_s26 }
 0x45b   : > { %1206 = vrot.lane.b32.xlu0 %v3873_v22, %s3691_s28 }
 0x45f   : > { %1257 = vrot.lane.b32.xlu0 %v3881_v37, %s3691_s28 }
 0x468   : > { %846 = vadd.xlane.f32.xlu1 %v845_v8 }
 0x479   : > { %1009 = vrot.lane.b32.xlu1 %v3879_v36, %s3689_s25 }
 0x47d   : > { %1155 = vrot.lane.b32.xlu1 %v3875_v23, %s3691_s28 }
 0x481   : > { %1259 = vrot.lane.b32.xlu1 %v3881_v37, %s3690_s26 }
 0x485   : > { %1310 = vrot.lane.b32.xlu1 %v3879_v36, %s3690_s26 }
 0x489   : > { %1308 = vrot.lane.b32.xlu1 %v3879_v36, %s3691_s28  ;;  %s3698_s28 = smov 40  }
 0x4ae   : > { %v826_v53 = vpop.xlane.xlu0 %825 }
 0x4b0   : > { %v829_v9 = vpop.xlane.xlu1 %828 }
 0x4b1   : > { %3566 = vrcp.f32 %v829_v9 }
 0x4b2   : > { %3568 = vrcp.f32 %v826_v53 }
 0x4b8   : > { %v841_v43 = vpop.xlane.xlu1 %840 }
 0x4bb   : > { %v3567_v18 = vpop.eup %3566 }
 0x4bc   : > { %v835_v10 = vpop.xlane.xlu1 %834  ;;  %v3569_v20 = vpop.eup %3568  ;;  %v857_v21 = vmul.f32 %v3567_v18, %v3927_v48 }
 0x4bd   : > { %3570 = vrcp.f32 %v835_v10  ;;  %v856_v26 = vmul.f32 %v3569_v20, %v3923_v24 }
 0x4be   : > { %v838_v13 = vpop.xlane.xlu0 %837 }
 0x4bf   : > { %3572 = vrcp.f32 %v838_v13  ;;  %v864_v30 = vpack.c.bf16 %v857_v21, %v856_v26 }
 0x4c0   : > { %v916_v14 = vpop.permute.xlu1 %915 }
 0x4c1   : > { %3270 = vmatpush3.bf16.msra.mxu1 %v916_v14 }
 0x4c2   : > { %v832_v15 = vpop.xlane.xlu0 %831  ;;  %3281 = vmatprep.subr.bf16.mxu1 %v3686_v52 }
 0x4c3   : > { %3574 = vrcp.f32 %v832_v15 }
 0x4c4   : > { %3576 = vrcp.f32 %v841_v43  ;;  %v963_v39 = vpop.permute.xlu1 %962 }
 0x4c6   : > { %v844_v19 = vpop.xlane.xlu0 %843 }
 0x4c7   : > { %v3571_v28 = vpop.eup %3570  ;;  %3578 = vrcp.f32 %v844_v19 }
 0x4c8   : > { %v859_v35 = vmul.f32 %v3571_v28, %v3935_v25 }
 0x4c9   : > { %v3573_v29 = vpop.eup %3572 }
 0x4ca   : > { %v869_v27 = vpop.permute.xlu0 %868  ;;  %v860_v41 = vmul.f32 %v3573_v29, %v3939_v60 }
 0x4cb   : > { %3264 = vmatpush3.bf16.msra.mxu0 %v869_v27  ;;  %v3134_v27 = vld [vmem:[%s4307_s7 + $0x8] sm:$0xff]  }
 0x4cc   : > { %3275 = vmatprep.subr.bf16.mxu0 %v3686_v52 }
 0x4cd   : > { %v3575_v31 = vpop.eup %3574 }
 0x4ce   : > { %v858_v38 = vmul.f32 %v3575_v31, %v3561_v62  ;;  %3266 = vmatmul.mubr.msk.bf16.vlgmr.msra.gmra.mrb[8].mxu0 %vm775_vm3, %v864_v30  ;;  %v3577_v40 = vpop.eup %3576  ;;  %v1158_v54 = vpop.permute.xlu0 %1157  ;;  %v3121_v30 = vunpack.c.l.bf16 %v3134_v27  ;;  %v3122_v31 = vunpack.c.h.bf16 %v3134_v27 }
 0x4cf   : > { %3276 = vmatpush3.bf16.msra.mxu0 %v963_v39  ;;  %3277 = vmatprep.mubr.msk.bf16.mxu0 %vm3687_vm1, %v3686_v52  ;;  %v861_v44 = vmul.f32 %v3577_v40, %v3931_v57  ;;  %v1163_v55 = vsel %vm577_vm2, %v1158_v54, 0 }
 0x4d0   : > { %v865_v24 = vpack.c.bf16 %v859_v35, %v858_v38  ;;  %3507 = vmatprep.subr.msk.bf16.mxu0 %vm1073_vm4, %v1060_v34 }
 0x4d1   : > { %v866_v45 = vpack.c.bf16 %v861_v44, %v860_v41  ;;  %v3579_v48 = vpop.eup %3578 }
 0x4d2   : > { %3272 = vmatmul.mubr.msk.bf16.vlgmr.msra.gmra.mrb[16].mxu1 %vm775_vm3, %v865_v24  ;;  %v862_v50 = vmul.f32 %v3579_v48, %v3944_v33  ;;  %v1209_v57 = vpop.permute.xlu0 %1208 }
 0x4d3   : > { %3283 = vmatprep.mubr.msk.bf16.mxu1 %vm3687_vm1, %v3686_v52  ;;  %v1214_v25 = vsel %vm577_vm2, %v1209_v57, 0 }
 0x4d6   : > { %3278 = vmatmul.mubr.msk.bf16.vlgmr.msra.gmra.mrb[12].mxu0 %vm775_vm3, %v866_v45  ;;  %v1207_v60 = vpop.permute.xlu0 %1206 }
 0x4d7   : > { %3288 = vmatpush3.bf16.msra.mxu0 %v1075_v63 }
 0x4d8   : > { %3309 = vmatprep.subr.bf16.mxu0 %v3686_v52 }
 0x4da   : > { %v1258_v44 = vpop.permute.xlu0 %1257 }
 0x4f5   : > { %v847_v46 = vpop.xlane.xlu1 %846 }
 0x4f6   : > { %3580 = vrcp.f32 %v847_v46 }
 0x4f9   : > { %v1010_v47 = vpop.permute.xlu1 %1009 }
 0x4fa   : > { %3282 = vmatpush3.bf16.msra.mxu1 %v1010_v47 }
 0x4fb   : > { %3297 = vmatprep.subr.bf16.mxu1 %v3686_v52 }
 0x4fd   : > { %v1156_v56 = vpop.permute.xlu1 %1155 }
 0x500   : > { %v3581_v49 = vpop.eup %3580 }
 0x501   : > { %v863_v51 = vmul.f32 %v3581_v49, %v3565_v7  ;;  %v1260_v58 = vpop.permute.xlu1 %1259 }
 0x502   : > { %v1265_v13 = vsel %vm577_vm2, %v1260_v58, 0 }
 0x503   : > { %v867_v32 = vpack.c.bf16 %v863_v51, %v862_v50 }
 0x505   : > { %3284 = vmatmul.mubr.msk.bf16.vlgmr.msra.gmra.mrb[20].mxu1 %vm775_vm3, %v867_v32  ;;  %v1311_v59 = vpop.permute.xlu1 %1310 }
 0x506   : > { %3298 = vmatpush3.bf16.xpose.msra.mxu1 %v1163_v55  ;;  %3299 = vmatprep.mubr.msk.bf16.mxu1 %vm3687_vm1, %v3686_v52  ;;  %v1316_v61 = vsel %vm577_vm2, %v1311_v59, 0 }
 0x507   : > { %3303 = vmatprep.subr.bf16.mxu1 %v3686_v52 }
 0x509   : > { %v1309_v62 = vpop.permute.xlu1 %1308 }
 0x50d   : > { %3300 = vmatmul.mubr.msk.bf16.vlgmr.msra.gmra.mrb[24].mxu1 %vm577_vm2, %v1156_v56 }
 0x50e   : > { %3304 = vmatpush3.bf16.xpose.msra.mxu1 %v1214_v25  ;;  %3305 = vmatprep.mubr.msk.bf16.mxu1 %vm3687_vm1, %v3686_v52 }
 0x50f   : > { %3315 = vmatprep.subr.bf16.mxu1 %v3686_v52 }
 0x515   : > { %3306 = vmatmul.mubr.msk.bf16.vlgmr.msra.gmra.mrb[28].mxu1 %vm577_vm2, %v1207_v60 }
 0x516   : > { %3316 = vmatpush3.bf16.xpose.msra.mxu1 %v1316_v61  ;;  %3317 = vmatprep.mubr.msk.bf16.mxu1 %vm3687_vm1, %v3686_v52 }
 0x517   : > { %3327 = vmatprep.subr.bf16.mxu1 %v3686_v52 }
 0x51d   : > { %3318 = vmatmul.mubr.msk.bf16.vlgmr.msra.gmra.mrb[32].mxu1 %vm577_vm2, %v1309_v62 }
 0x51e   : > { %3329 = vmatprep.mubr.msk.bf16.mxu1 %vm3687_vm1, %v3686_v52 }
 0x5a1   : > { %v908_v33 = vpop.f32.mrb[8].mxu0 }
 0x5a2   : > { %v3267_v42 = vpop.f32.mrb[9].mxu0 }
 0x5a3   : > { %v911_v0 = vpop.f32.mrb[10].mxu0 }
 0x5a4   : > { %v1056_v1 = vpack.c.bf16 %v911_v0, %v908_v33  ;;  %v3268_v6 = vpop.f32.mrb[11].mxu0 }
 0x5a5   : > { %v955_v7 = vpop.f32.mrb[16].mxu1 }
 0x5a6   : > { %v3273_v8 = vpop.f32.mrb[17].mxu1  ;;  %3289 = vmatprep.mubr.msk.bf16.mxu0 %vm577_vm2, %v1056_v1 }
 0x5a7   : > { %v958_v9 = vpop.f32.mrb[18].mxu1 }
 0x5a8   : > { %v1057_v43 = vpack.c.bf16 %v958_v9, %v955_v7  ;;  %v3274_v53 = vpop.f32.mrb[19].mxu1 }
 0x5a9   : > { %v1002_v10 = vpop.f32.mrb[12].mxu0 }
 0x5aa   : > { %v3279_v14 = vpop.f32.mrb[13].mxu0  ;;  %3290 = vmatmul.mubr.msk.bf16.vlgmr.msra.gmra.mrb[16].mxu0 %vm577_vm2, %v1057_v43 }
 0x5ab   : > { %3310 = vmatpush3.bf16.xpose.msra.mxu0 %v1265_v13  ;;  %v1005_v15 = vpop.f32.mrb[14].mxu0 }
 0x5ac   : > { %v1058_v18 = vpack.c.bf16 %v1005_v15, %v1002_v10  ;;  %v3280_v19 = vpop.f32.mrb[15].mxu0  ;;  %3321 = vmatprep.subr.bf16.mxu0 %v3686_v52 }
 0x5ae   : > { %3293 = vmatprep.mubr.msk.bf16.mxu0 %vm577_vm2, %v1058_v18 }
 0x5d8   : > { %v1049_v20 = vpop.f32.mrb[20].mxu1 }
 0x5d9   : > { %v3285_v21 = vpop.f32.mrb[21].mxu1 }
 0x5da   : > { %v1052_v26 = vpop.f32.mrb[22].mxu1 }
 0x5db   : > { %v1059_v28 = vpack.c.bf16 %v1052_v26, %v1049_v20  ;;  %v3286_v29 = vpop.f32.mrb[23].mxu1 }
 0x5dd   : > { %3294 = vmatmul.mubr.msk.bf16.gmra.mrb[20].mxu0 %vm577_vm2, %v1059_v28 }
 0x5de   : > { %3311 = vmatprep.mubr.msk.bf16.mxu0 %vm3687_vm1, %v3686_v52 }
 0x5e0   : > { %v1199_v34 = vpop.f32.mrb[24].mxu1 }
 0x5e1   : > { %v1200_v35 = vadd.f32 %v3121_v30, %v1199_v34  ;;  %v3301_v38 = vpop.f32.mrb[25].mxu1 }
 0x5e2   : > { %v1202_v39 = vpop.f32.mrb[26].mxu1 }
 0x5e3   : > { %v1203_v40 = vadd.f32 %v3122_v31, %v1202_v39  ;;  %v3302_v41 = vpop.f32.mrb[27].mxu1  ;;  %v1359_v24 = vsel %vm775_vm3, %v1200_v35, -inf }
 0x5e4   : > { %1360 = vmax.xlane.f32.xlu0 %v1359_v24 }
 0x5e5   : > { %3312 = vmatmul.mubr.msk.bf16.vlgmr.msra.gmra.mrb[24].mxu0 %vm577_vm2, %v1258_v44  ;;  %v1362_v45 = vsel %vm775_vm3, %v1203_v40, -inf }
 0x5e6   : > { %1363 = vmax.xlane.f32.xlu1 %v1362_v45  ;;  %3323 = vmatprep.mubr.msk.bf16.mxu0 %vm3687_vm1, %v3686_v52 }
 0x5e8   : > { %v1250_v46 = vpop.f32.mrb[28].mxu1 }
 0x5e9   : > { %v1251_v47 = vadd.f32 %v3121_v30, %v1250_v46  ;;  %v3307_v48 = vpop.f32.mrb[29].mxu1 }
 0x5ea   : > { %v1253_v49 = vpop.f32.mrb[30].mxu1 }
 0x5eb   : > { %v1254_v50 = vadd.f32 %v3122_v31, %v1253_v49  ;;  %v3308_v51 = vpop.f32.mrb[31].mxu1  ;;  %v1365_v54 = vsel %vm775_vm3, %v1251_v47, -inf }
 0x5ec   : > { %1366 = vmax.xlane.f32.xlu0 %v1365_v54 }
 0x5ed   : > { %v1368_v32 = vsel %vm775_vm3, %v1254_v50, -inf }
 0x5f0   : > { %1369 = vmax.xlane.f32.xlu0 %v1368_v32  ;;  %v1352_v55 = vpop.f32.mrb[32].mxu1 }
 0x5f1   : > { %v3319_v56 = vpop.f32.mrb[33].mxu1  ;;  %v1353_v10 = vadd.f32 %v3121_v30, %v1352_v55 }
 0x5f2   : > { %v1355_v57 = vpop.f32.mrb[34].mxu1 }
 0x5f3   : > { %v3320_v58 = vpop.f32.mrb[35].mxu1  ;;  %v1356_v18 = vadd.f32 %v3122_v31, %v1355_v57  ;;  %v1377_v20 = vsel %vm775_vm3, %v1353_v10, -inf }
 0x5f5   : > { %v1380_v26 = vsel %vm775_vm3, %v1356_v18, -inf }
 0x671   : > { %v1361_v25 = vpop.xlane.xlu0 %1360 }
 0x672   : > { %v1383_v61 = vsub.f32 %v1200_v35, %v1361_v25 }
 0x673   : > { %v1364_v60 = vpop.xlane.xlu1 %1363 }
 0x674   : > { %v1384_v62 = vsub.f32 %v1203_v40, %v1364_v60  ;;  %v1391_v33 = vmul.f32 1.442695, %v1383_v61 }
 0x676   : > { %v1393_v0 = vmul.f32 1.442695, %v1384_v62  ;;  %3582 = vpow2.f32 %v1391_v33 }
 0x678   : > { %3584 = vpow2.f32 %v1393_v0 }
 0x679   : > { %v1367_v59 = vpop.xlane.xlu0 %1366 }
 0x67a   : > { %v1385_v42 = vsub.f32 %v1251_v47, %v1367_v59 }
 0x67c   : > { %v1395_v6 = vmul.f32 1.442695, %v1385_v42 }
 0x67d   : > { %v1370_v63 = vpop.xlane.xlu0 %1369 }
 0x67e   : > { %v1386_v1 = vsub.f32 %v1254_v50, %v1370_v63  ;;  %3586 = vpow2.f32 %v1395_v6 }
 0x680   : > { %v1397_v7 = vmul.f32 1.442695, %v1386_v1  ;;  %v4023_v21 = vpop.eup %3582 }
 0x681   : > { %v1407_v28 = vsel %vm775_vm3, %v4023_v21, 0.0 }
 0x682   : > { %3588 = vpow2.f32 %v1397_v7  ;;  %v4026_v27 = vpop.eup %3584 }
 0x688   : > { %v4030_v29 = vpop.eup %3586 }
 0x689   : > { %v1413_v34 = vsel %vm775_vm3, %v4030_v29, 0.0 }
 0x6b8   : > { %v1301_v8 = vpop.f32.mrb[24].mxu0 }
 0x6b9   : > { %v1302_v9 = vadd.f32 %v3121_v30, %v1301_v8  ;;  %v3313_v43 = vpop.f32.mrb[25].mxu0  ;;  %v1410_v30 = vsel %vm775_vm3, %v4026_v27, 0.0 }
 0x6ba   : > { %v1304_v53 = vpop.f32.mrb[26].mxu0 }
 0x6bb   : > { %v1305_v13 = vadd.f32 %v3122_v31, %v1304_v53  ;;  %v3314_v14 = vpop.f32.mrb[27].mxu0  ;;  %v1371_v15 = vsel %vm775_vm3, %v1302_v9, -inf  ;;  %v3589_v31 = vpop.eup %3588 }
 0x6bc   : > { %1372 = vmax.xlane.f32.xlu0 %v1371_v15  ;;  %v1416_v35 = vsel %vm775_vm3, %v3589_v31, 0.0 }
 0x6bd   : > { %v1374_v19 = vsel %vm775_vm3, %v1305_v13, -inf }
 0x6be   : > { %1375 = vmax.xlane.f32.xlu1 %v1374_v19 }
 0x6c0   : > { %1378 = vmax.xlane.f32.xlu0 %v1377_v20 }
 0x6c2   : > { %1381 = vmax.xlane.f32.xlu1 %v1380_v26 }
 0x6c4   : > { %1408 = vadd.xlane.f32.xlu0 %v1407_v28 }
 0x6c6   : > { %1411 = vadd.xlane.f32.xlu1 %v1410_v30 }
 0x6c8   : > { %1414 = vadd.xlane.f32.xlu0 %v1413_v34 }
 0x6ca   : > { %1417 = vadd.xlane.f32.xlu1 %v1416_v35 }
 0x749   : > { %v1373_v38 = vpop.xlane.xlu0 %1372 }
 0x74a   : > { %v1387_v39 = vsub.f32 %v1302_v9, %v1373_v38 }
 0x74b   : > { %v1376_v40 = vpop.xlane.xlu1 %1375 }
 0x74c   : > { %v1399_v44 = vmul.f32 1.442695, %v1387_v39  ;;  %v1388_v56 = vsub.f32 %v1305_v13, %v1376_v40 }
 0x74d   : > { %v1379_v41 = vpop.xlane.xlu0 %1378 }
 0x74e   : > { %v1389_v24 = vsub.f32 %v1353_v10, %v1379_v41  ;;  %v1401_v57 = vmul.f32 1.442695, %v1388_v56 }
 0x74f   : > { %v1382_v45 = vpop.xlane.xlu1 %1381 }
 0x750   : > { %v1403_v46 = vmul.f32 1.442695, %v1389_v24  ;;  %v1390_v47 = vsub.f32 %v1356_v18, %v1382_v45  ;;  %v1643_v18 = vld [vmem:[%s4303_s3 + $0x4] sm:$0xf] }
 0x751   : > { %v1409_v60 = vpop.xlane.xlu0 %1408 }
 0x752   : > { %3590 = vpow2.f32 %v1403_v46  ;;  %v1405_v48 = vmul.f32 1.442695, %v1390_v47 }
 0x753   : > { %3592 = vpow2.f32 %v1399_v44  ;;  %v1412_v59 = vpop.xlane.xlu1 %1411  ;;  %v1657_v44 = vsel %vm1073_vm4, %v1643_v18, 0 }
 0x754   : > { %3594 = vpow2.f32 %v1405_v48 }
 0x755   : > { %3596 = vpow2.f32 %v1401_v57  ;;  %v1415_v62 = vpop.xlane.xlu0 %1414 }
 0x757   : > { %v1418_v61 = vpop.xlane.xlu1 %1417 }
 0x758   : > { %3598 = vrcp.f32 %v1418_v61 }
 0x759   : > { %3600 = vrcp.f32 %v1412_v59 }
 0x75a   : > { %3602 = vrcp.f32 %v1415_v62 }
 0x75b   : > { %3604 = vrcp.f32 %v1409_v60 }
 0x75c   : > { %v4037_v49 = vpop.eup %3590 }
 0x75d   : > { %v4039_v50 = vpop.eup %3592  ;;  %v1425_v51 = vsel %vm775_vm3, %v4037_v49, 0.0 }
 0x75e   : > { %v4043_v54 = vpop.eup %3594  ;;  %1426 = vadd.xlane.f32.xlu0 %v1425_v51  ;;  %v1419_v55 = vsel %vm775_vm3, %v4039_v50, 0.0 }
 0x75f   : > { %v1428_v32 = vsel %vm775_vm3, %v4043_v54, 0.0  ;;  %v3597_v58 = vpop.eup %3596 }
 0x760   : > { %1429 = vadd.xlane.f32.xlu1 %v1428_v32  ;;  %v1422_v25 = vsel %vm775_vm3, %v3597_v58, 0.0 }
 0x762   : > { %1420 = vadd.xlane.f32.xlu0 %v1419_v55  ;;  %v3599_v33 = vpop.eup %3598 }
 0x763   : > { %v3601_v42 = vpop.eup %3600  ;;  %v1442_v6 = vmul.f32 %v3599_v33, %v3589_v31 }
 0x764   : > { %v3603_v1 = vpop.eup %3602  ;;  %v1440_v9 = vmul.f32 %v3601_v42, %v4026_v27 }
 0x765   : > { %v3605_v8 = vpop.eup %3604  ;;  %v1441_v43 = vmul.f32 %v3603_v1, %v4030_v29 }
 0x766   : > { %v1439_v10 = vmul.f32 %v3605_v8, %v4023_v21 }
 0x767   : > { %v1448_v14 = vpack.c.bf16 %v1442_v6, %v1441_v43  ;;  %v3135_v6 = vld [vmem:[%s4307_s7 + $0x10] sm:$0xff]  }
 0x768   : > { %v1447_v15 = vpack.c.bf16 %v1440_v9, %v1439_v10  ;;  %v3125_v43 = vunpack.c.l.bf16 %v3135_v6 }
 0x771   : > { %1498 = vrot.lane.b32.xlu1 %v3873_v22, %s3692_s13 }
 0x775   : > { %1545 = vrot.lane.b32.xlu1 %v3881_v37, %s3692_s13 }
 0x778   : > { %1451 = vrot.lane.b32.xlu0 %v3875_v23, %s3692_s13 }
 0x77c   : > { %1739 = vrot.lane.b32.xlu0 %v3875_v23, %s3693_s14 }
 0x780   : > { %1790 = vrot.lane.b32.xlu0 %v3873_v22, %s3693_s14 }
 0x784   : > { %1788 = vrot.lane.b32.xlu0 %v3873_v22, %s3694_s15 }
 0x788   : > { %1839 = vrot.lane.b32.xlu0 %v3881_v37, %s3694_s15 }
 0x799   : > { %1423 = vadd.xlane.f32.xlu1 %v1422_v25 }
 0x7aa   : > { %1592 = vrot.lane.b32.xlu1 %v3879_v36, %s3692_s13 }
 0x7ae   : > { %1737 = vrot.lane.b32.xlu1 %v3875_v23, %s3694_s15 }
 0x7b2   : > { %1841 = vrot.lane.b32.xlu1 %v3881_v37, %s3693_s14 }
 0x7b6   : > { %1892 = vrot.lane.b32.xlu1 %v3879_v36, %s3693_s14 }
 0x7ba   : > { %1890 = vrot.lane.b32.xlu1 %v3879_v36, %s3694_s15  ;;  %s4274_s15 = scalar_lea.vmem %s4308_s8, %s3014_s30 }
 0x7eb   : > { %v1427_v63 = vpop.xlane.xlu0 %1426 }
 0x7ed   : > { %v1430_v0 = vpop.xlane.xlu1 %1429 }
 0x7ee   : > { %3606 = vrcp.f32 %v1430_v0 }
 0x7ef   : > { %v1421_v7 = vpop.xlane.xlu0 %1420  ;;  %3608 = vrcp.f32 %v1427_v63 }
 0x7f0   : > { %3610 = vrcp.f32 %v1421_v7 }
 0x7f1   : > { %v1499_v53 = vpop.permute.xlu1 %1498 }
 0x7f2   : > { %3328 = vmatpush3.bf16.msra.mxu1 %v1499_v53 }
 0x7f3   : > { %v1452_v13 = vpop.permute.xlu0 %1451  ;;  %3339 = vmatprep.subr.bf16.mxu1 %v3686_v52 }
 0x7f4   : > { %3322 = vmatpush3.bf16.msra.mxu0 %v1452_v13  ;;  %v3126_v13 = vunpack.c.h.bf16 %v3135_v6 }
 0x7f5   : > { %3330 = vmatmul.mubr.msk.bf16.vlgmr.msra.gmra.mrb[36].mxu1 %vm775_vm3, %v1448_v14  ;;  %3333 = vmatprep.subr.bf16.mxu0 %v3686_v52  ;;  %v1546_v19 = vpop.permute.xlu1 %1545 }
 0x7f6   : > { %3341 = vmatprep.mubr.msk.bf16.mxu1 %vm3687_vm1, %v3686_v52 }
 0x7f7   : > { %3324 = vmatmul.mubr.msk.bf16.vlgmr.msra.gmra.mrb[28].mxu0 %vm775_vm3, %v1447_v15  ;;  %v1740_v34 = vpop.permute.xlu0 %1739 }
 0x7f8   : > { %3334 = vmatpush3.bf16.msra.mxu0 %v1546_v19  ;;  %3335 = vmatprep.mubr.msk.bf16.mxu0 %vm3687_vm1, %v3686_v52  ;;  %v3607_v20 = vpop.eup %3606  ;;  %v1745_v40 = vsel %vm577_vm2, %v1740_v34, 0 }
 0x7f9   : > { %3508 = vmatprep.subr.msk.bf16.mxu0 %vm1073_vm4, %v1643_v18  ;;  %v3609_v26 = vpop.eup %3608  ;;  %v1446_v27 = vmul.f32 %v3607_v20, %v4043_v54 }
 0x7fa   : > { %v1445_v28 = vmul.f32 %v3609_v26, %v4037_v49  ;;  %v3611_v31 = vpop.eup %3610 }
 0x7fb   : > { %v1443_v38 = vmul.f32 %v3611_v31, %v4039_v50  ;;  %v1791_v45 = vpop.permute.xlu0 %1790 }
 0x7fc   : > { %v1450_v30 = vpack.c.bf16 %v1446_v27, %v1445_v28  ;;  %v1796_v47 = vsel %vm577_vm2, %v1791_v45, 0 }
 0x7ff   : > { %v1789_v49 = vpop.permute.xlu0 %1788 }
 0x803   : > { %v1840_v28 = vpop.permute.xlu0 %1839 }
 0x826   : > { %v1424_v21 = vpop.xlane.xlu1 %1423 }
 0x827   : > { %3612 = vrcp.f32 %v1424_v21 }
 0x82a   : > { %v1593_v29 = vpop.permute.xlu1 %1592 }
 0x82b   : > { %3340 = vmatpush3.bf16.msra.mxu1 %v1593_v29 }
 0x82c   : > { %3355 = vmatprep.subr.bf16.mxu1 %v3686_v52 }
 0x82e   : > { %3342 = vmatmul.mubr.msk.bf16.vlgmr.msra.gmra.mrb[40].mxu1 %vm775_vm3, %v1450_v30  ;;  %v1738_v41 = vpop.permute.xlu1 %1737 }
 0x82f   : > { %3357 = vmatprep.mubr.msk.bf16.mxu1 %vm3687_vm1, %v3686_v52 }
 0x831   : > { %v3613_v35 = vpop.eup %3612 }
 0x832   : > { %v1444_v39 = vmul.f32 %v3613_v35, %v3597_v58  ;;  %v1842_v46 = vpop.permute.xlu1 %1841 }
 0x833   : > { %v1847_v62 = vsel %vm577_vm2, %v1842_v46, 0 }
 0x834   : > { %3356 = vmatpush3.bf16.xpose.msra.mxu1 %v1745_v40  ;;  %v1449_v24 = vpack.c.bf16 %v1444_v39, %v1443_v38 }
 0x835   : > { %3361 = vmatprep.subr.bf16.mxu1 %v3686_v52 }
 0x836   : > { %3336 = vmatmul.mubr.msk.bf16.vlgmr.msra.gmra.mrb[32].mxu0 %vm775_vm3, %v1449_v24  ;;  %v1893_v48 = vpop.permute.xlu1 %1892 }
 0x837   : > { %3346 = vmatpush3.bf16.msra.mxu0 %v1657_v44  ;;  %v1898_v50 = vsel %vm577_vm2, %v1893_v48, 0 }
 0x838   : > { %3367 = vmatprep.subr.bf16.mxu0 %v3686_v52 }
 0x83a   : > { %v1891_v51 = vpop.permute.xlu1 %1890 }
 0x83b   : > { %3358 = vmatmul.mubr.msk.bf16.vlgmr.msra.gmra.mrb[44].mxu1 %vm577_vm2, %v1738_v41 }
 0x83c   : > { %3362 = vmatpush3.bf16.xpose.msra.mxu1 %v1796_v47  ;;  %3363 = vmatprep.mubr.msk.bf16.mxu1 %vm3687_vm1, %v3686_v52 }
 0x83d   : > { %3373 = vmatprep.subr.bf16.mxu1 %v3686_v52 }
 0x843   : > { %3364 = vmatmul.mubr.msk.bf16.vlgmr.msra.gmra.mrb[48].mxu1 %vm577_vm2, %v1789_v49 }
 0x844   : > { %3374 = vmatpush3.bf16.xpose.msra.mxu1 %v1898_v50  ;;  %3375 = vmatprep.mubr.msk.bf16.mxu1 %vm3687_vm1, %v3686_v52 }
 0x845   : > { %3385 = vmatprep.subr.bf16.mxu1 %v3686_v52 }
 0x84b   : > { %3376 = vmatmul.mubr.msk.bf16.vlgmr.msra.gmra.mrb[52].mxu1 %vm577_vm2, %v1891_v51 }
 0x84c   : > { %3387 = vmatprep.mubr.msk.bf16.mxu1 %vm3687_vm1, %v3686_v52 }
 0x8c8   : > { %v1538_v54 = vpop.f32.mrb[36].mxu1 }
 0x8c9   : > { %v3331_v32 = vpop.f32.mrb[37].mxu1 }
 0x8ca   : > { %v1491_v55 = vpop.f32.mrb[28].mxu0  ;;  %v1541_v56 = vpop.f32.mrb[38].mxu1 }
 0x8cb   : > { %v1640_v57 = vpack.c.bf16 %v1541_v56, %v1538_v54  ;;  %v3325_v58 = vpop.f32.mrb[29].mxu0  ;;  %v3332_v25 = vpop.f32.mrb[39].mxu1 }
 0x8cc   : > { %v1494_v59 = vpop.f32.mrb[30].mxu0 }
 0x8cd   : > { %v1639_v60 = vpack.c.bf16 %v1494_v59, %v1491_v55  ;;  %v3326_v61 = vpop.f32.mrb[31].mxu0 }
 0x8cf   : > { %3347 = vmatprep.mubr.msk.bf16.mxu0 %vm577_vm2, %v1639_v60 }
 0x8d0   : > { %3348 = vmatmul.mubr.msk.bf16.vlgmr.msra.gmra.mrb[16].mxu0 %vm577_vm2, %v1640_v57 }
 0x8d1   : > { %3368 = vmatpush3.bf16.xpose.msra.mxu0 %v1847_v62 }
 0x8d2   : > { %3379 = vmatprep.subr.bf16.mxu0 %v3686_v52 }
 0x901   : > { %v1632_v63 = vpop.f32.mrb[40].mxu1 }
 0x902   : > { %v3343_v33 = vpop.f32.mrb[41].mxu1 }
 0x903   : > { %v1635_v42 = vpop.f32.mrb[42].mxu1 }
 0x904   : > { %v1642_v0 = vpack.c.bf16 %v1635_v42, %v1632_v63  ;;  %v3344_v1 = vpop.f32.mrb[43].mxu1 }
 0x909   : > { %v1585_v7 = vpop.f32.mrb[32].mxu0 }
 0x90a   : > { %v3337_v8 = vpop.f32.mrb[33].mxu0 }
 0x90b   : > { %v1588_v9 = vpop.f32.mrb[34].mxu0 }
 0x90c   : > { %v1641_v53 = vpack.c.bf16 %v1588_v9, %v1585_v7  ;;  %v3338_v10 = vpop.f32.mrb[35].mxu0 }
 0x90e   : > { %3351 = vmatprep.mubr.msk.bf16.mxu0 %vm577_vm2, %v1641_v53  ;;  %v1781_v14 = vpop.f32.mrb[44].mxu1 }
 0x90f   : > { %v1782_v15 = vadd.f32 %v3125_v43, %v1781_v14  ;;  %3352 = vmatmul.mubr.msk.bf16.gmra.mrb[20].mxu0 %vm577_vm2, %v1642_v0  ;;  %v3359_v18 = vpop.f32.mrb[45].mxu1 }
 0x910   : > { %v1784_v19 = vpop.f32.mrb[46].mxu1  ;;  %3369 = vmatprep.mubr.msk.bf16.mxu0 %vm3687_vm1, %v3686_v52 }
 0x911   : > { %v1785_v20 = vadd.f32 %v3126_v13, %v1784_v19  ;;  %v3360_v21 = vpop.f32.mrb[47].mxu1  ;;  %v1941_v26 = vsel %vm775_vm3, %v1782_v15, -inf }
 0x912   : > { %1942 = vmax.xlane.f32.xlu0 %v1941_v26 }
 0x913   : > { %v1944_v27 = vsel %vm775_vm3, %v1785_v20, -inf }
 0x914   : > { %1945 = vmax.xlane.f32.xlu1 %v1944_v27 }
 0x916   : > { %v1832_v29 = vpop.f32.mrb[48].mxu1 }
 0x917   : > { %v1833_v30 = vadd.f32 %v3125_v43, %v1832_v29  ;;  %v3365_v31 = vpop.f32.mrb[49].mxu1  ;;  %3370 = vmatmul.mubr.msk.bf16.vlgmr.msra.gmra.mrb[36].mxu0 %vm577_vm2, %v1840_v28 }
 0x918   : > { %v1835_v34 = vpop.f32.mrb[50].mxu1  ;;  %3381 = vmatprep.mubr.msk.bf16.mxu0 %vm3687_vm1, %v3686_v52 }
 0x919   : > { %v1836_v35 = vadd.f32 %v3126_v13, %v1835_v34  ;;  %v3366_v38 = vpop.f32.mrb[51].mxu1  ;;  %v1947_v39 = vsel %vm775_vm3, %v1833_v30, -inf }
 0x91a   : > { %1948 = vmax.xlane.f32.xlu0 %v1947_v39 }
 0x91b   : > { %v1950_v40 = vsel %vm775_vm3, %v1836_v35, -inf }
 0x91e   : > { %1951 = vmax.xlane.f32.xlu0 %v1950_v40  ;;  %v1934_v41 = vpop.f32.mrb[52].mxu1 }
 0x91f   : > { %v3377_v24 = vpop.f32.mrb[53].mxu1  ;;  %v1935_v62 = vadd.f32 %v3125_v43, %v1934_v41 }
 0x920   : > { %v1937_v44 = vpop.f32.mrb[54].mxu1 }
 0x921   : > { %v3378_v45 = vpop.f32.mrb[55].mxu1  ;;  %v1938_v0 = vadd.f32 %v3126_v13, %v1937_v44  ;;  %v1959_v6 = vsel %vm775_vm3, %v1935_v62, -inf }
 0x923   : > { %v1962_v8 = vsel %vm775_vm3, %v1938_v0, -inf }
 0x99f   : > { %v1943_v46 = vpop.xlane.xlu0 %1942 }
 0x9a0   : > { %v1965_v49 = vsub.f32 %v1782_v15, %v1943_v46 }
 0x9a1   : > { %v1946_v48 = vpop.xlane.xlu1 %1945 }
 0x9a2   : > { %v1966_v50 = vsub.f32 %v1785_v20, %v1946_v48  ;;  %v1973_v54 = vmul.f32 1.442695, %v1965_v49 }
 0x9a4   : > { %v1975_v55 = vmul.f32 1.442695, %v1966_v50  ;;  %3614 = vpow2.f32 %v1973_v54 }
 0x9a6   : > { %3616 = vpow2.f32 %v1975_v55 }
 0x9a7   : > { %v1949_v47 = vpop.xlane.xlu0 %1948 }
 0x9a8   : > { %v1967_v32 = vsub.f32 %v1833_v30, %v1949_v47 }
 0x9aa   : > { %v1977_v57 = vmul.f32 1.442695, %v1967_v32 }
 0x9ab   : > { %v1952_v51 = vpop.xlane.xlu0 %1951 }
 0x9ac   : > { %v1968_v56 = vsub.f32 %v1836_v35, %v1952_v51  ;;  %3618 = vpow2.f32 %v1977_v57 }
 0x9ae   : > { %v1979_v58 = vmul.f32 1.442695, %v1968_v56  ;;  %v4123_v7 = vpop.eup %3614 }
 0x9b0   : > { %3620 = vpow2.f32 %v1979_v58  ;;  %v4126_v9 = vpop.eup %3616 }
 0x9b1   : > { %v1992_v10 = vsel %vm775_vm3, %v4126_v9, 0.0 }
 0x9b6   : > { %v4130_v53 = vpop.eup %3618 }
 0x9b7   : > { %v1995_v14 = vsel %vm775_vm3, %v4130_v53, 0.0 }
 0x9ea   : > { %v1883_v25 = vpop.f32.mrb[36].mxu0 }
 0x9eb   : > { %v1884_v59 = vadd.f32 %v3125_v43, %v1883_v25  ;;  %v3371_v60 = vpop.f32.mrb[37].mxu0  ;;  %v1989_v43 = vsel %vm775_vm3, %v4123_v7, 0.0 }
 0x9ec   : > { %v1886_v61 = vpop.f32.mrb[38].mxu0 }
 0x9ed   : > { %v1887_v63 = vadd.f32 %v3126_v13, %v1886_v61  ;;  %v3372_v33 = vpop.f32.mrb[39].mxu0  ;;  %v1953_v42 = vsel %vm775_vm3, %v1884_v59, -inf  ;;  %v3621_v13 = vpop.eup %3620 }
 0x9ee   : > { %1954 = vmax.xlane.f32.xlu0 %v1953_v42  ;;  %v1998_v15 = vsel %vm775_vm3, %v3621_v13, 0.0 }
 0x9ef   : > { %v1956_v1 = vsel %vm775_vm3, %v1887_v63, -inf }
 0x9f0   : > { %1957 = vmax.xlane.f32.xlu1 %v1956_v1 }
 0x9f2   : > { %1960 = vmax.xlane.f32.xlu0 %v1959_v6 }
 0x9f4   : > { %1963 = vmax.xlane.f32.xlu1 %v1962_v8 }
 0x9f6   : > { %1990 = vadd.xlane.f32.xlu0 %v1989_v43 }
 0x9f8   : > { %1993 = vadd.xlane.f32.xlu1 %v1992_v10 }
 0x9fa   : > { %1996 = vadd.xlane.f32.xlu0 %v1995_v14 }
 0x9fc   : > { %1999 = vadd.xlane.f32.xlu1 %v1998_v15 }
 0xa7b   : > { %v1955_v18 = vpop.xlane.xlu0 %1954 }
 0xa7c   : > { %v1969_v19 = vsub.f32 %v1884_v59, %v1955_v18 }
 0xa7d   : > { %v1958_v20 = vpop.xlane.xlu1 %1957 }
 0xa7e   : > { %v1981_v27 = vmul.f32 1.442695, %v1969_v19  ;;  %v1970_v24 = vsub.f32 %v1887_v63, %v1958_v20 }
 0xa7f   : > { %v1961_v21 = vpop.xlane.xlu0 %1960 }
 0xa80   : > { %v1971_v26 = vsub.f32 %v1935_v62, %v1961_v21  ;;  %v1983_v44 = vmul.f32 1.442695, %v1970_v24 }
 0xa81   : > { %v1964_v28 = vpop.xlane.xlu1 %1963 }
 0xa82   : > { %v1985_v29 = vmul.f32 1.442695, %v1971_v26  ;;  %v1972_v30 = vsub.f32 %v1938_v0, %v1964_v28  ;;  %v2225_v0 = vld [vmem:[%s4303_s3 + $0x8] sm:$0xf] }
 0xa83   : > { %v1991_v48 = vpop.xlane.xlu0 %1990 }
 0xa84   : > { %3622 = vpow2.f32 %v1985_v29  ;;  %v1987_v31 = vmul.f32 1.442695, %v1972_v30 }
 0xa85   : > { %3624 = vpow2.f32 %v1981_v27  ;;  %v1994_v47 = vpop.xlane.xlu1 %1993  ;;  %v2239_v27 = vsel %vm1073_vm4, %v2225_v0, 0 }
 0xa86   : > { %3626 = vpow2.f32 %v1987_v31 }
 0xa87   : > { %3628 = vpow2.f32 %v1983_v44  ;;  %v1997_v50 = vpop.xlane.xlu0 %1996 }
 0xa89   : > { %v2000_v49 = vpop.xlane.xlu1 %1999 }
 0xa8a   : > { %3630 = vrcp.f32 %v2000_v49 }
 0xa8b   : > { %3632 = vrcp.f32 %v1994_v47 }
 0xa8c   : > { %3634 = vrcp.f32 %v1997_v50 }
 0xa8d   : > { %3636 = vrcp.f32 %v1991_v48 }
 0xa8e   : > { %v4137_v34 = vpop.eup %3622 }
 0xa8f   : > { %v4139_v35 = vpop.eup %3624  ;;  %v2007_v38 = vsel %vm775_vm3, %v4137_v34, 0.0 }
 0xa90   : > { %v4143_v39 = vpop.eup %3626  ;;  %2008 = vadd.xlane.f32.xlu0 %v2007_v38  ;;  %v2001_v41 = vsel %vm775_vm3, %v4139_v35, 0.0 }
 0xa91   : > { %v2010_v40 = vsel %vm775_vm3, %v4143_v39, 0.0  ;;  %v3629_v45 = vpop.eup %3628 }
 0xa92   : > { %2011 = vadd.xlane.f32.xlu1 %v2010_v40  ;;  %v2004_v46 = vsel %vm775_vm3, %v3629_v45, 0.0 }
 0xa94   : > { %2002 = vadd.xlane.f32.xlu0 %v2001_v41  ;;  %v3631_v54 = vpop.eup %3630 }
 0xa95   : > { %v3633_v32 = vpop.eup %3632  ;;  %v2024_v57 = vmul.f32 %v3631_v54, %v3621_v13 }
 0xa96   : > { %v3635_v56 = vpop.eup %3634  ;;  %v2022_v59 = vmul.f32 %v3633_v32, %v4126_v9 }
 0xa97   : > { %v3637_v25 = vpop.eup %3636  ;;  %v2023_v60 = vmul.f32 %v3635_v56, %v4130_v53 }
 0xa98   : > { %v2021_v62 = vmul.f32 %v3637_v25, %v4123_v7 }
 0xa99   : > { %v2030_v33 = vpack.c.bf16 %v2024_v57, %v2023_v60  ;;  %v3136_v57 = vld [vmem:[%s4307_s7 + $0x18] sm:$0xff]  }
 0xa9a   : > { %v2029_v42 = vpack.c.bf16 %v2022_v59, %v2021_v62  ;;  %v3129_v60 = vunpack.c.l.bf16 %v3136_v57 }
 0xaa3   : > { %2080 = vrot.lane.b32.xlu1 %v3873_v22, %s3695_s20 }
 0xaa7   : > { %2127 = vrot.lane.b32.xlu1 %v3881_v37, %s3695_s20 }
 0xaaa   : > { %2033 = vrot.lane.b32.xlu0 %v3875_v23, %s3695_s20 }
 0xaae   : > { %2321 = vrot.lane.b32.xlu0 %v3875_v23, %s3696_s21 }
 0xab2   : > { %2372 = vrot.lane.b32.xlu0 %v3873_v22, %s3696_s21 }
 0xab6   : > { %2370 = vrot.lane.b32.xlu0 %v3873_v22, %s3697_s22 }
 0xaba   : > { %2421 = vrot.lane.b32.xlu0 %v3881_v37, %s3697_s22 }
 0xacb   : > { %2005 = vadd.xlane.f32.xlu1 %v2004_v46 }
 0xadc   : > { %2174 = vrot.lane.b32.xlu1 %v3879_v36, %s3695_s20 }
 0xae0   : > { %2319 = vrot.lane.b32.xlu1 %v3875_v23, %s3697_s22 }
 0xae4   : > { %2423 = vrot.lane.b32.xlu1 %v3881_v37, %s3696_s21 }
 0xae8   : > { %2474 = vrot.lane.b32.xlu1 %v3879_v36, %s3696_s21 }
 0xaec   : > { %2472 = vrot.lane.b32.xlu1 %v3879_v36, %s3697_s22 }
 0xb1d   : > { %v2009_v51 = vpop.xlane.xlu0 %2008 }
 0xb1f   : > { %v2012_v55 = vpop.xlane.xlu1 %2011 }
 0xb20   : > { %3638 = vrcp.f32 %v2012_v55 }
 0xb21   : > { %v2003_v58 = vpop.xlane.xlu0 %2002  ;;  %3640 = vrcp.f32 %v2009_v51 }
 0xb22   : > { %3642 = vrcp.f32 %v2003_v58 }
 0xb23   : > { %v2081_v61 = vpop.permute.xlu1 %2080 }
 0xb24   : > { %3386 = vmatpush3.bf16.msra.mxu1 %v2081_v61 }
 0xb25   : > { %v2034_v63 = vpop.permute.xlu0 %2033  ;;  %3397 = vmatprep.subr.bf16.mxu1 %v3686_v52 }
 0xb26   : > { %3380 = vmatpush3.bf16.msra.mxu0 %v2034_v63  ;;  %v3130_v63 = vunpack.c.h.bf16 %v3136_v57 }
 0xb27   : > { %3388 = vmatmul.mubr.msk.bf16.vlgmr.msra.gmra.mrb[56].mxu1 %vm775_vm3, %v2030_v33  ;;  %3391 = vmatprep.subr.bf16.mxu0 %v3686_v52  ;;  %v2128_v1 = vpop.permute.xlu1 %2127 }
 0xb28   : > { %3399 = vmatprep.mubr.msk.bf16.mxu1 %vm3687_vm1, %v3686_v52 }
 0xb29   : > { %3382 = vmatmul.mubr.msk.bf16.vlgmr.msra.gmra.mrb[40].mxu0 %vm775_vm3, %v2029_v42  ;;  %v2322_v14 = vpop.permute.xlu0 %2321 }
 0xb2a   : > { %3392 = vmatpush3.bf16.msra.mxu0 %v2128_v1  ;;  %3393 = vmatprep.mubr.msk.bf16.mxu0 %vm3687_vm1, %v3686_v52  ;;  %v3639_v6 = vpop.eup %3638  ;;  %v2327_v20 = vsel %vm577_vm2, %v2322_v14, 0 }
 0xb2b   : > { %3509 = vmatprep.subr.msk.bf16.mxu0 %vm1073_vm4, %v2225_v0  ;;  %v3641_v8 = vpop.eup %3640  ;;  %v2028_v9 = vmul.f32 %v3639_v6, %v4143_v39 }
 0xb2c   : > { %v2027_v43 = vmul.f32 %v3641_v8, %v4137_v34  ;;  %v3643_v13 = vpop.eup %3642 }
 0xb2d   : > { %v2025_v18 = vmul.f32 %v3643_v13, %v4139_v35  ;;  %v2373_v28 = vpop.permute.xlu0 %2372 }
 0xb2e   : > { %v2032_v10 = vpack.c.bf16 %v2028_v9, %v2027_v43  ;;  %v2378_v30 = vsel %vm577_vm2, %v2373_v28, 0 }
 0xb31   : > { %v2371_v34 = vpop.permute.xlu0 %2370 }
 0xb35   : > { %v2422_v43 = vpop.permute.xlu0 %2421 }
 0xb58   : > { %v2006_v7 = vpop.xlane.xlu1 %2005 }
 0xb59   : > { %3644 = vrcp.f32 %v2006_v7 }
 0xb5c   : > { %v2175_v53 = vpop.permute.xlu1 %2174 }
 0xb5d   : > { %3398 = vmatpush3.bf16.msra.mxu1 %v2175_v53 }
 0xb5e   : > { %3413 = vmatprep.subr.bf16.mxu1 %v3686_v52 }
 0xb60   : > { %3400 = vmatmul.mubr.msk.bf16.vlgmr.msra.gmra.mrb[60].mxu1 %vm775_vm3, %v2032_v10  ;;  %v2320_v21 = vpop.permute.xlu1 %2319 }
 0xb61   : > { %3415 = vmatprep.mubr.msk.bf16.mxu1 %vm3687_vm1, %v3686_v52 }
 0xb63   : > { %v3645_v15 = vpop.eup %3644 }
 0xb64   : > { %v2026_v19 = vmul.f32 %v3645_v15, %v3629_v45  ;;  %v2424_v29 = vpop.permute.xlu1 %2423 }
 0xb65   : > { %v2429_v50 = vsel %vm577_vm2, %v2424_v29, 0 }
 0xb66   : > { %3414 = vmatpush3.bf16.xpose.msra.mxu1 %v2327_v20  ;;  %v2031_v26 = vpack.c.bf16 %v2026_v19, %v2025_v18 }
 0xb67   : > { %3419 = vmatprep.subr.bf16.mxu1 %v3686_v52 }
 0xb68   : > { %3394 = vmatmul.mubr.msk.bf16.vlgmr.msra.gmra.mrb[44].mxu0 %vm775_vm3, %v2031_v26  ;;  %v2475_v31 = vpop.permute.xlu1 %2474 }
 0xb69   : > { %3404 = vmatpush3.bf16.msra.mxu0 %v2239_v27  ;;  %v2480_v35 = vsel %vm577_vm2, %v2475_v31, 0 }
 0xb6a   : > { %3425 = vmatprep.subr.bf16.mxu0 %v3686_v52 }
 0xb6c   : > { %v2473_v38 = vpop.permute.xlu1 %2472 }
 0xb6d   : > { %3416 = vmatmul.mubr.msk.bf16.vlgmr.msra.gmra.mrb[64].mxu1 %vm577_vm2, %v2320_v21 }
 0xb6e   : > { %3420 = vmatpush3.bf16.xpose.msra.mxu1 %v2378_v30  ;;  %3421 = vmatprep.mubr.msk.bf16.mxu1 %vm3687_vm1, %v3686_v52 }
 0xb6f   : > { %3431 = vmatprep.subr.bf16.mxu1 %v3686_v52 }
 0xb75   : > { %3422 = vmatmul.mubr.msk.bf16.vlgmr.msra.gmra.mrb[68].mxu1 %vm577_vm2, %v2371_v34 }
 0xb76   : > { %3432 = vmatpush3.bf16.xpose.msra.mxu1 %v2480_v35  ;;  %3433 = vmatprep.mubr.msk.bf16.mxu1 %vm3687_vm1, %v3686_v52 }
 0xb77   : > { %3443 = vmatprep.subr.bf16.mxu1 %v3686_v52 }
 0xb7d   : > { %3434 = vmatmul.mubr.msk.bf16.vlgmr.msra.gmra.mrb[72].mxu1 %vm577_vm2, %v2473_v38 }
 0xb7e   : > { %3445 = vmatprep.mubr.msk.bf16.mxu1 %vm3687_vm1, %v3686_v52 }
 0xbfa   : > { %v2120_v39 = vpop.f32.mrb[56].mxu1 }
 0xbfb   : > { %v3389_v40 = vpop.f32.mrb[57].mxu1 }
 0xbfc   : > { %v2073_v41 = vpop.f32.mrb[40].mxu0  ;;  %v2123_v24 = vpop.f32.mrb[58].mxu1 }
 0xbfd   : > { %v2222_v44 = vpack.c.bf16 %v2123_v24, %v2120_v39  ;;  %v3383_v45 = vpop.f32.mrb[41].mxu0  ;;  %v3390_v46 = vpop.f32.mrb[59].mxu1 }
 0xbfe   : > { %v2076_v47 = vpop.f32.mrb[42].mxu0 }
 0xbff   : > { %v2221_v48 = vpack.c.bf16 %v2076_v47, %v2073_v41  ;;  %v3384_v49 = vpop.f32.mrb[43].mxu0 }
 0xc01   : > { %3405 = vmatprep.mubr.msk.bf16.mxu0 %vm577_vm2, %v2221_v48 }
 0xc02   : > { %3406 = vmatmul.mubr.msk.bf16.vlgmr.msra.gmra.mrb[16].mxu0 %vm577_vm2, %v2222_v44 }
 0xc03   : > { %3426 = vmatpush3.bf16.xpose.msra.mxu0 %v2429_v50 }
 0xc04   : > { %3437 = vmatprep.subr.bf16.mxu0 %v3686_v52 }
 0xc33   : > { %v2214_v51 = vpop.f32.mrb[60].mxu1 }
 0xc34   : > { %v3401_v54 = vpop.f32.mrb[61].mxu1 }
 0xc35   : > { %v2217_v32 = vpop.f32.mrb[62].mxu1 }
 0xc36   : > { %v2224_v55 = vpack.c.bf16 %v2217_v32, %v2214_v51  ;;  %v3402_v56 = vpop.f32.mrb[63].mxu1 }
 0xc3b   : > { %v2167_v58 = vpop.f32.mrb[44].mxu0 }
 0xc3c   : > { %v3395_v25 = vpop.f32.mrb[45].mxu0 }
 0xc3d   : > { %v2170_v59 = vpop.f32.mrb[46].mxu0 }
 0xc3e   : > { %v2223_v61 = vpack.c.bf16 %v2170_v59, %v2167_v58  ;;  %v3396_v62 = vpop.f32.mrb[47].mxu0 }
 0xc40   : > { %3409 = vmatprep.mubr.msk.bf16.mxu0 %vm577_vm2, %v2223_v61  ;;  %v2363_v33 = vpop.f32.mrb[64].mxu1 }
 0xc41   : > { %v2364_v42 = vadd.f32 %v3129_v60, %v2363_v33  ;;  %3410 = vmatmul.mubr.msk.bf16.gmra.mrb[20].mxu0 %vm577_vm2, %v2224_v55  ;;  %v3417_v0 = vpop.f32.mrb[65].mxu1 }
 0xc42   : > { %v2366_v1 = vpop.f32.mrb[66].mxu1  ;;  %3427 = vmatprep.mubr.msk.bf16.mxu0 %vm3687_vm1, %v3686_v52 }
 0xc43   : > { %v2367_v6 = vadd.f32 %v3130_v63, %v2366_v1  ;;  %v3418_v7 = vpop.f32.mrb[67].mxu1  ;;  %v2523_v8 = vsel %vm775_vm3, %v2364_v42, -inf }
 0xc44   : > { %2524 = vmax.xlane.f32.xlu0 %v2523_v8 }
 0xc45   : > { %v2526_v9 = vsel %vm775_vm3, %v2367_v6, -inf }
 0xc46   : > { %2527 = vmax.xlane.f32.xlu1 %v2526_v9 }
 0xc48   : > { %v2414_v53 = vpop.f32.mrb[68].mxu1 }
 0xc49   : > { %v2415_v10 = vadd.f32 %v3129_v60, %v2414_v53  ;;  %v3423_v13 = vpop.f32.mrb[69].mxu1  ;;  %3428 = vmatmul.mubr.msk.bf16.vlgmr.msra.gmra.mrb[48].mxu0 %vm577_vm2, %v2422_v43 }
 0xc4a   : > { %v2417_v14 = vpop.f32.mrb[70].mxu1  ;;  %3439 = vmatprep.mubr.msk.bf16.mxu0 %vm3687_vm1, %v3686_v52 }
 0xc4b   : > { %v2418_v15 = vadd.f32 %v3130_v63, %v2417_v14  ;;  %v3424_v18 = vpop.f32.mrb[71].mxu1  ;;  %v2529_v19 = vsel %vm775_vm3, %v2415_v10, -inf }
 0xc4c   : > { %2530 = vmax.xlane.f32.xlu0 %v2529_v19 }
 0xc4d   : > { %v2532_v20 = vsel %vm775_vm3, %v2418_v15, -inf }
 0xc50   : > { %2533 = vmax.xlane.f32.xlu0 %v2532_v20  ;;  %v2516_v21 = vpop.f32.mrb[72].mxu1 }
 0xc51   : > { %v3435_v26 = vpop.f32.mrb[73].mxu1  ;;  %v2517_v50 = vadd.f32 %v3129_v60, %v2516_v21 }
 0xc52   : > { %v2519_v27 = vpop.f32.mrb[74].mxu1 }
 0xc53   : > { %v3436_v28 = vpop.f32.mrb[75].mxu1  ;;  %v2520_v55 = vadd.f32 %v3130_v63, %v2519_v27  ;;  %v2541_v57 = vsel %vm775_vm3, %v2517_v50, -inf }
 0xc55   : > { %v2544_v25 = vsel %vm775_vm3, %v2520_v55, -inf }
 0xcd1   : > { %v2525_v29 = vpop.xlane.xlu0 %2524 }
 0xcd2   : > { %v2547_v34 = vsub.f32 %v2364_v42, %v2525_v29 }
 0xcd3   : > { %v2528_v31 = vpop.xlane.xlu1 %2527 }
 0xcd4   : > { %v2548_v35 = vsub.f32 %v2367_v6, %v2528_v31  ;;  %v2555_v39 = vmul.f32 1.442695, %v2547_v34 }
 0xcd6   : > { %v2557_v41 = vmul.f32 1.442695, %v2548_v35  ;;  %3646 = vpow2.f32 %v2555_v39 }
 0xcd8   : > { %3648 = vpow2.f32 %v2557_v41 }
 0xcd9   : > { %v2531_v30 = vpop.xlane.xlu0 %2530 }
 0xcda   : > { %v2549_v40 = vsub.f32 %v2415_v10, %v2531_v30 }
 0xcdc   : > { %v2559_v44 = vmul.f32 1.442695, %v2549_v40 }
 0xcdd   : > { %v2534_v38 = vpop.xlane.xlu0 %2533 }
 0xcde   : > { %v2550_v24 = vsub.f32 %v2418_v15, %v2534_v38  ;;  %3650 = vpow2.f32 %v2559_v44 }
 0xce0   : > { %v2561_v45 = vmul.f32 1.442695, %v2550_v24  ;;  %v4223_v58 = vpop.eup %3646 }
 0xce2   : > { %3652 = vpow2.f32 %v2561_v45  ;;  %v3649_v59 = vpop.eup %3648 }
 0xce3   : > { %v2574_v62 = vsel %vm775_vm3, %v3649_v59, 0.0 }
 0xce8   : > { %v3651_v61 = vpop.eup %3650 }
 0xce9   : > { %v2577_v33 = vsel %vm775_vm3, %v3651_v61, 0.0 }
 0xd1c   : > { %v2465_v46 = vpop.f32.mrb[48].mxu0 }
 0xd1d   : > { %v2466_v47 = vadd.f32 %v3129_v60, %v2465_v46  ;;  %v3429_v48 = vpop.f32.mrb[49].mxu0  ;;  %v2571_v60 = vsel %vm775_vm3, %v4223_v58, 0.0 }
 0xd1e   : > { %v2468_v49 = vpop.f32.mrb[50].mxu0 }
 0xd1f   : > { %v2469_v51 = vadd.f32 %v3130_v63, %v2468_v49  ;;  %v3430_v54 = vpop.f32.mrb[51].mxu0  ;;  %v2535_v32 = vsel %vm775_vm3, %v2466_v47, -inf  ;;  %v3653_v63 = vpop.eup %3652 }
 0xd20   : > { %2536 = vmax.xlane.f32.xlu0 %v2535_v32  ;;  %v2580_v42 = vsel %vm775_vm3, %v3653_v63, 0.0 }
 0xd21   : > { %v2538_v56 = vsel %vm775_vm3, %v2469_v51, -inf }
 0xd22   : > { %2539 = vmax.xlane.f32.xlu1 %v2538_v56 }
 0xd24   : > { %2542 = vmax.xlane.f32.xlu0 %v2541_v57 }
 0xd26   : > { %2545 = vmax.xlane.f32.xlu1 %v2544_v25 }
 0xd28   : > { %2572 = vadd.xlane.f32.xlu0 %v2571_v60 }
 0xd2a   : > { %2575 = vadd.xlane.f32.xlu1 %v2574_v62  ;;  %v2807_v62 = vld [vmem:[%s4303_s3 + $0xc] sm:$0xf] }
 0xd2c   : > { %2578 = vadd.xlane.f32.xlu0 %v2577_v33 }
 0xd2e   : > { %2581 = vadd.xlane.f32.xlu1 %v2580_v42 }
 0xdad   : > { %v2537_v0 = vpop.xlane.xlu0 %2536 }
 0xdae   : > { %v2551_v1 = vsub.f32 %v2466_v47, %v2537_v0 }
 0xdaf   : > { %v2540_v6 = vpop.xlane.xlu1 %2539 }
 0xdb0   : > { %v2563_v9 = vmul.f32 1.442695, %v2551_v1  ;;  %v2552_v26 = vsub.f32 %v2469_v51, %v2540_v6 }
 0xdb1   : > { %v2543_v7 = vpop.xlane.xlu0 %2542 }
 0xdb2   : > { %v2553_v8 = vsub.f32 %v2517_v50, %v2543_v7  ;;  %v2565_v27 = vmul.f32 1.442695, %v2552_v26 }
 0xdb3   : > { %v2546_v43 = vpop.xlane.xlu1 %2545 }
 0xdb4   : > { %v2567_v53 = vmul.f32 1.442695, %v2553_v8  ;;  %v2554_v10 = vsub.f32 %v2520_v55, %v2546_v43 }
 0xdb5   : > { %v2573_v31 = vpop.xlane.xlu0 %2572 }
 0xdb6   : > { %3654 = vpow2.f32 %v2567_v53  ;;  %v2569_v13 = vmul.f32 1.442695, %v2554_v10 }
 0xdb7   : > { %3656 = vpow2.f32 %v2563_v9  ;;  %v2576_v30 = vpop.xlane.xlu1 %2575 }
 0xdb8   : > { %3658 = vpow2.f32 %v2569_v13 }
 0xdb9   : > { %3660 = vpow2.f32 %v2565_v27  ;;  %v2579_v35 = vpop.xlane.xlu0 %2578 }
 0xdbb   : > { %v2582_v34 = vpop.xlane.xlu1 %2581 }
 0xdbc   : > { %3662 = vrcp.f32 %v2582_v34 }
 0xdbd   : > { %3664 = vrcp.f32 %v2576_v30 }
 0xdbe   : > { %3666 = vrcp.f32 %v2579_v35 }
 0xdbf   : > { %3668 = vrcp.f32 %v2573_v31 }
 0xdc0   : > { %v3655_v14 = vpop.eup %3654 }
 0xdc1   : > { %v4231_v15 = vpop.eup %3656  ;;  %v2589_v18 = vsel %vm775_vm3, %v3655_v14, 0.0 }
 0xdc2   : > { %v3659_v19 = vpop.eup %3658  ;;  %2590 = vadd.xlane.f32.xlu0 %v2589_v18  ;;  %v2583_v21 = vsel %vm775_vm3, %v4231_v15, 0.0 }
 0xdc3   : > { %v2592_v20 = vsel %vm775_vm3, %v3659_v19, 0.0  ;;  %v3661_v28 = vpop.eup %3660 }
 0xdc4   : > { %2593 = vadd.xlane.f32.xlu1 %v2592_v20  ;;  %v2586_v29 = vsel %vm775_vm3, %v3661_v28, 0.0 }
 0xdc6   : > { %2584 = vadd.xlane.f32.xlu0 %v2583_v21 }
 0xdd5   : > { %2662 = vrot.lane.b32.xlu1 %v3873_v22, %s3698_s28 }
 0xdd9   : > { %2709 = vrot.lane.b32.xlu1 %v3881_v37, %s3698_s28  ;;  %v3663_v37 = vpop.eup %3662 }
 0xdda   : > { %v2606_v40 = vmul.f32 %v3663_v37, %v3653_v63  ;;  %v2821_v63 = vsel %vm1073_vm4, %v2807_v62, 0 }
 0xddc   : > { %2615 = vrot.lane.b32.xlu0 %v3875_v23, %s3698_s28  ;;  %v3665_v23 = vpop.eup %3664 }
 0xddd   : > { %v3667_v39 = vpop.eup %3666  ;;  %v2604_v44 = vmul.f32 %v3665_v23, %v3649_v59 }
 0xdde   : > { %v3669_v24 = vpop.eup %3668  ;;  %v2605_v45 = vmul.f32 %v3667_v39, %v3651_v61 }
 0xde0   : > { %v2612_v48 = vpack.c.bf16 %v2606_v40, %v2605_v45 }
 0xdfd   : > { %2587 = vadd.xlane.f32.xlu1 %v2586_v29  ;;  %v3080_v29 = vld [vmem:[%s4304_s4] ss:$0 sm:$0xff] }
 0xe0e   : > { %2756 = vrot.lane.b32.xlu1 %v3879_v36, %s3698_s28  ;;  %v2603_v36 = vmul.f32 %v3669_v24, %v4223_v58 }
 0xe10   : > { %v2611_v49 = vpack.c.bf16 %v2604_v44, %v2603_v36 }
 0xe4f   : > { %v2591_v22 = vpop.xlane.xlu0 %2590 }
 0xe51   : > { %v2594_v38 = vpop.xlane.xlu1 %2593 }
 0xe52   : > { %3670 = vrcp.f32 %v2594_v38 }
 0xe53   : > { %v2585_v41 = vpop.xlane.xlu0 %2584  ;;  %3672 = vrcp.f32 %v2591_v22 }
 0xe54   : > { %3674 = vrcp.f32 %v2585_v41 }
 0xe55   : > { %v2663_v46 = vpop.permute.xlu1 %2662 }
 0xe56   : > { %3444 = vmatpush3.bf16.msra.mxu1 %v2663_v46 }
 0xe57   : > { %v2616_v47 = vpop.permute.xlu0 %2615  ;;  %3455 = vmatprep.subr.bf16.mxu1 %v3686_v52 }
 0xe58   : > { %3438 = vmatpush3.bf16.msra.mxu0 %v2616_v47 }
 0xe59   : > { %3446 = vmatmul.mubr.msk.bf16.vlgmr.msra.gmra.mrb[76].mxu1 %vm775_vm3, %v2612_v48  ;;  %3449 = vmatprep.subr.bf16.mxu0 %v3686_v52  ;;  %v2710_v50 = vpop.permute.xlu1 %2709 }
 0xe5a   : > { %3457 = vmatprep.mubr.msk.bf16.mxu1 %vm3687_vm1, %v3686_v52 }
 0xe5b   : > { %3440 = vmatmul.mubr.msk.bf16.vlgmr.msra.gmra.mrb[52].mxu0 %vm775_vm3, %v2611_v49 }
 0xe5c   : > { %3450 = vmatpush3.bf16.msra.mxu0 %v2710_v50  ;;  %3451 = vmatprep.mubr.msk.bf16.mxu0 %vm3687_vm1, %v3686_v52  ;;  %v3671_v51 = vpop.eup %3670 }
 0xe5d   : > { %v3673_v32 = vpop.eup %3672  ;;  %v2610_v55 = vmul.f32 %v3671_v51, %v3659_v19  ;;  %3510 = vmatprep.subr.msk.bf16.mxu0 %vm1073_vm4, %v2807_v62 }
 0xe5e   : > { %v2609_v56 = vmul.f32 %v3673_v32, %v3655_v14  ;;  %v3675_v25 = vpop.eup %3674 }
 0xe5f   : > { %v2607_v60 = vmul.f32 %v3675_v25, %v4231_v15 }
 0xe60   : > { %v2614_v58 = vpack.c.bf16 %v2610_v55, %v2609_v56 }
 0xe8a   : > { %v2588_v54 = vpop.xlane.xlu1 %2587 }
 0xe8b   : > { %3676 = vrcp.f32 %v2588_v54 }
 0xe8e   : > { %v2757_v57 = vpop.permute.xlu1 %2756 }
 0xe8f   : > { %3456 = vmatpush3.bf16.msra.mxu1 %v2757_v57 }
 0xe92   : > { %3458 = vmatmul.mubr.msk.bf16.vlgmr.msra.gmra.mrb[80].mxu1 %vm775_vm3, %v2614_v58 }
 0xe95   : > { %v3677_v59 = vpop.eup %3676 }
 0xe96   : > { %v2608_v61 = vmul.f32 %v3677_v59, %v3661_v28 }
 0xe98   : > { %v2613_v52 = vpack.c.bf16 %v2608_v61, %v2607_v60 }
 0xe9a   : > { %3452 = vmatmul.mubr.msk.bf16.vlgmr.msra.gmra.mrb[56].mxu0 %vm775_vm3, %v2613_v52 }
 0xe9b   : > { %3462 = vmatpush3.bf16.msra.mxu0 %v2821_v63 }
 0xf2c   : > { %v2702_v33 = vpop.f32.mrb[76].mxu1 }
 0xf2d   : > { %v3447_v42 = vpop.f32.mrb[77].mxu1 }
 0xf2e   : > { %v2655_v0 = vpop.f32.mrb[52].mxu0  ;;  %v2705_v1 = vpop.f32.mrb[78].mxu1 }
 0xf2f   : > { %v2804_v6 = vpack.c.bf16 %v2705_v1, %v2702_v33  ;;  %v3441_v7 = vpop.f32.mrb[53].mxu0  ;;  %v3448_v8 = vpop.f32.mrb[79].mxu1 }
 0xf30   : > { %v2658_v9 = vpop.f32.mrb[54].mxu0 }
 0xf31   : > { %v2803_v43 = vpack.c.bf16 %v2658_v9, %v2655_v0  ;;  %v3442_v53 = vpop.f32.mrb[55].mxu0 }
 0xf33   : > { %3463 = vmatprep.mubr.msk.bf16.mxu0 %vm577_vm2, %v2803_v43 }
 0xf34   : > { %3464 = vmatmul.mubr.msk.bf16.vlgmr.msra.gmra.mrb[16].mxu0 %vm577_vm2, %v2804_v6 }
 0xf65   : > { %v2796_v10 = vpop.f32.mrb[80].mxu1 }
 0xf66   : > { %v3459_v13 = vpop.f32.mrb[81].mxu1 }
 0xf67   : > { %v2799_v14 = vpop.f32.mrb[82].mxu1 }
 0xf68   : > { %v2806_v15 = vpack.c.bf16 %v2799_v14, %v2796_v10  ;;  %v3460_v18 = vpop.f32.mrb[83].mxu1 }
 0xf6d   : > { %v2749_v19 = vpop.f32.mrb[56].mxu0 }
 0xf6e   : > { %v3453_v20 = vpop.f32.mrb[57].mxu0 }
 0xf6f   : > { %v2752_v21 = vpop.f32.mrb[58].mxu0 }
 0xf70   : > { %v2805_v26 = vpack.c.bf16 %v2752_v21, %v2749_v19  ;;  %v3454_v27 = vpop.f32.mrb[59].mxu0 }
 0xf72   : > { %3467 = vmatprep.mubr.msk.bf16.mxu0 %vm577_vm2, %v2805_v26 }
 0xf73   : > { %3468 = vmatmul.mubr.msk.bf16.gmra.mrb[20].mxu0 %vm577_vm2, %v2806_v15 }
0x1007   : > { %v3465_v28 = vpop.f32.mrb[16].mxu0 }
0x1008   : > { %v3475_v30 = vadd.f32 %v3465_v28, %v3762_v3  ;;  %v2857_v31 = vpop.f32.mrb[17].mxu0 }
0x1009   : > { %v3476_v34 = vadd.f32 %v3760_v2, %v2857_v31  ;;  %v3466_v35 = vpop.f32.mrb[18].mxu0 }
0x100a   : > { %v2905_v22 = vadd.f32 %v3475_v30, %v3080_v29  ;;  %v3477_v37 = vadd.f32 %v3466_v35, %v3766_v5  ;;  %v2860_v23 = vpop.f32.mrb[19].mxu0 }
0x100b   : > { %v2903_v3 = vadd.f32 %v3476_v34, %v3080_v29  ;;  %v3478_v38 = vadd.f32 %v3764_v4, %v2860_v23 }
0x100c   : > { %v3093_v2 = vpack.c.bf16 %v2905_v22, %v2905_v22  ;;  %v2906_v39 = vadd.f32 %v3477_v37, %v3080_v29 }
0x100d   : > { %v3091_v40 = vpack.c.bf16 %v2903_v3, %v2903_v3  ;;  %v2904_v41 = vadd.f32 %v3478_v38, %v3080_v29 }
0x100e   : > { %2946 = vst.msk [vmem:[%s4274_s15 + $0x8] sm:$0xf] %vm2943_vm5, %v3093_v2  ;;  %v3094_v5 = vpack.c.bf16 %v2906_v39, %v2906_v39 }
0x100f   : > { %2944 = vst.msk [vmem:[%s4274_s15] sm:$0xf] %vm2943_vm5, %v3091_v40  ;;  %v3092_v24 = vpack.c.bf16 %v2904_v41, %v2904_v41 }
0x1010   : > { %2947 = vst.msk [vmem:[%s4274_s15 + $0xc] sm:$0xf] %vm2943_vm5, %v3094_v5 }
0x1011   : > { %2945 = vst.msk [vmem:[%s4274_s15 + $0x4] sm:$0xf] %vm2943_vm5, %v3092_v24 }
0x1046   : > { %v3469_v44 = vpop.f32.mrb[20].mxu0 }
0x1047   : > { %v3479_v45 = vadd.f32 %v3469_v44, %v3784_v16  ;;  %v2873_v4 = vpop.f32.mrb[21].mxu0 }
0x1048   : > { %v3480_v46 = vadd.f32 %v3776_v11, %v2873_v4  ;;  %v3470_v36 = vpop.f32.mrb[22].mxu0 }
0x1049   : > { %v2909_v47 = vadd.f32 %v3479_v45, %v3080_v29  ;;  %v3481_v48 = vadd.f32 %v3470_v36, %v3786_v17  ;;  %v2876_v49 = vpop.f32.mrb[23].mxu0 }
0x104a   : > { %v2907_v50 = vadd.f32 %v3480_v46, %v3080_v29  ;;  %v3482_v51 = vadd.f32 %v3778_v12, %v2876_v49 }
0x104b   : > { %v3097_v54 = vpack.c.bf16 %v2909_v47, %v2909_v47  ;;  %v2910_v32 = vadd.f32 %v3481_v48, %v3080_v29 }
0x104c   : > { %v3095_v55 = vpack.c.bf16 %v2907_v50, %v2907_v50  ;;  %v2908_v56 = vadd.f32 %v3482_v51, %v3080_v29 }
0x104d   : > { %2950 = vst.msk [vmem:[%s4274_s15 + $0x18] sm:$0xf] %vm2943_vm5, %v3097_v54  ;;  %v3098_v16 = vpack.c.bf16 %v2910_v32, %v2910_v32 }
0x104e   : > { %2948 = vst.msk [vmem:[%s4274_s15 + $0x10] sm:$0xf] %vm2943_vm5, %v3095_v55  ;;  %v3096_v57 = vpack.c.bf16 %v2908_v56, %v2908_v56 }
0x104f   : > { %2951 = vst.msk [vmem:[%s4274_s15 + $0x1c] sm:$0xf] %vm2943_vm5, %v3098_v16 }
0x1050   : > { %2949 = vst.msk [vmem:[%s4274_s15 + $0x14] sm:$0xf] %vm2943_vm5, %v3096_v57 }
0x1051 PF: > { %s18_s27 = sadd.s32 1, %s3684_s27  }
0x1052   : > { %p15_p4 = scmp.ge.s32.totalorder %s18_s27, 4  }
0x1054   :  { %17 = sbr.rel (!%p15_p4) target bundleno = 1 (0x1), region = 85 }

</bundles_post_ra>
